<compile_context>
chip_gen: v6e
topology: v6e:2x2x1
jax: 0.10.0
libtpu: 0.0.40
codegen_flags: <defaults>
</compile_context>

<pallas_src>
import functools

import jax
import jax.numpy as jnp
from jax import lax
from jax.experimental import pallas as pl
from jax.experimental.pallas import tpu as pltpu

EPS = 1e-5
DA_HIDDEN = 512          # _ImageDA Conv1 output channels
_CHUNK = 512             # lanes per normalization / DA-head chunk (multiple of 128)


def _softplus(x):
    # numerically stable log(1 + exp(x))
    return jnp.maximum(x, 0.0) + jnp.log(1.0 + jnp.exp(-jnp.abs(x)))


# ----------------------------------------------------------------------------
# Fused kernel: AdaIN swap + normalized-feature moments + _ImageDA NLL partials
# ----------------------------------------------------------------------------
def _fused_adain_da_kernel(src_ref, tgt_ref, w1_ref, w2d_ref,
                           fake_src_ref, fake_tgt_ref, stats_ref,
                           *, hw_real, chunk):
    """One grid step == one image.

    src_ref / tgt_ref : (1, C, HW_pad) block of the padded (N, C, HW_pad) view.
    w1_ref            : (512, C) bf16 Conv1 weight (out, in), 1x1, no bias.
    w2d_ref           : (1, 512) bf16 = W2[0] - W2[1] (2-class head collapsed).
    fake_*_ref        : (1, C, HW_pad) AdaIN-swapped outputs (input dtype).
    stats_ref         : (1, 8, 128) lane-dense per-image partial sums:
                          sublane 0: sum(src_norm^3)   1: sum(src_norm^4)
                          sublane 2: sum(tgt_norm^3)   3: sum(tgt_norm^4)
                          sublane 4: sum NLL (source, label=1)
                          sublane 5: sum NLL (target, label=0)
    """
    c = src_ref.shape[1]
    hw_pad = src_ref.shape[2]
    out_dtype = fake_src_ref.dtype

    # ---- pass 1: one-pass per-channel sums (f32 accumulation, chunked) -----
    s_sum = jnp.zeros((c, 1), jnp.float32)
    s_sq = jnp.zeros((c, 1), jnp.float32)
    t_sum = jnp.zeros((c, 1), jnp.float32)
    t_sq = jnp.zeros((c, 1), jnp.float32)
    for start in range(0, hw_pad, chunk):
        size = min(chunk, hw_pad - start)
        sc = src_ref[0, :, pl.ds(start, size)].astype(jnp.float32)
        tc = tgt_ref[0, :, pl.ds(start, size)].astype(jnp.float32)
        s_sum += jnp.sum(sc, axis=-1, keepdims=True)
        s_sq += jnp.sum(sc * sc, axis=-1, keepdims=True)
        t_sum += jnp.sum(tc, axis=-1, keepdims=True)
        t_sq += jnp.sum(tc * tc, axis=-1, keepdims=True)

    # padded lanes are zero, so sums already only cover real pixels
    inv_n = 1.0 / hw_real
    inv_nm1 = 1.0 / (hw_real - 1)
    s_mean = s_sum * inv_n
    t_mean = t_sum * inv_n
    s_var = (s_sq - s_sum * s_mean) * inv_nm1    # unbiased (torch .var default)
    t_var = (t_sq - t_sum * t_mean) * inv_nm1
    s_inv_std = lax.rsqrt(s_var + EPS)           # EUP op, VALU stays free
    t_inv_std = lax.rsqrt(t_var + EPS)
    s_std = (s_var + EPS) * s_inv_std            # sqrt via one extra VPU mul
    t_std = (t_var + EPS) * t_inv_std

    w1 = w1_ref[...]        # (512, C)  bf16
    w2d = w2d_ref[...]      # (1, 512)  bf16

    s3 = jnp.float32(0.0)
    s4 = jnp.float32(0.0)
    t3 = jnp.float32(0.0)
    t4 = jnp.float32(0.0)
    loss_s = jnp.float32(0.0)
    loss_t = jnp.float32(0.0)

    # ---- pass 2: normalize, AdaIN swap, moments, DA head — all chunked -----
    for start in range(0, hw_pad, chunk):
        size = min(chunk, hw_pad - start)
        sc = src_ref[0, :, pl.ds(start, size)].astype(jnp.float32)
        tc = tgt_ref[0, :, pl.ds(start, size)].astype(jnp.float32)
        sn = (sc - s_mean) * s_inv_std           # (C, size)
        tn = (tc - t_mean) * t_inv_std

        has_pad = (start + size) > hw_real       # only possible in last chunk
        if has_pad:
            valid = (lax.broadcasted_iota(jnp.int32, (1, size), 1) + start) < hw_real
            sn = jnp.where(valid, sn, 0.0)
            tn = jnp.where(valid, tn, 0.0)

        # AdaIN swap (lane-dense, 128-aligned stores in the input dtype)
        fake_src_ref[0, :, pl.ds(start, size)] = (tn * s_std + s_mean).astype(out_dtype)
        fake_tgt_ref[0, :, pl.ds(start, size)] = (sn * t_std + t_mean).astype(out_dtype)

        # skew / kurtosis partial sums (padded lanes already zeroed)
        sn2 = sn * sn
        tn2 = tn * tn
        s3 += jnp.sum(sn2 * sn)
        s4 += jnp.sum(sn2 * sn2)
        t3 += jnp.sum(tn2 * tn)
        t4 += jnp.sum(tn2 * tn2)

        # Fused _ImageDA head.  Source & target chunks share one W1 matmul.
        # For 2 classes:  -logp[1] = softplus(s0 - s1),  -logp[0] = softplus(s1 - s0),
        # and s0 - s1 = (W2[0]-W2[1]) @ h, so a single (1,512) GEMM row suffices.
        st = jnp.concatenate([sn, tn], axis=1).astype(jnp.bfloat16)   # (C, 2*size)
        h = jnp.maximum(
            jnp.dot(w1, st, preferred_element_type=jnp.float32), 0.0)  # (512, 2*size)
        d = jnp.dot(w2d, h.astype(jnp.bfloat16),
                    preferred_element_type=jnp.float32)                # (1, 2*size)
        sp_s = _softplus(d[:, :size])       # source label = 1  -> -logp[1]
        sp_t = _softplus(-d[:, size:])      # target label = 0  -> -logp[0]
        if has_pad:
            sp_s = jnp.where(valid, sp_s, 0.0)
            sp_t = jnp.where(valid, sp_t, 0.0)
        loss_s += jnp.sum(sp_s)
        loss_t += jnp.sum(sp_t)

    # ---- lane-dense per-image partials (no 6-lane masked store) ------------
    sub = lax.broadcasted_iota(jnp.int32, (8, 128), 0)
    stats_ref[0] = jnp.where(
        sub == 0, s3, jnp.where(
            sub == 1, s4, jnp.where(
                sub == 2, t3, jnp.where(
                    sub == 3, t4, jnp.where(
                        sub == 4, loss_s, jnp.where(
                            sub == 5, loss_t, 0.0))))))


# ----------------------------------------------------------------------------
# VMEM budget: generation-aware (v5e/v6e 128 MiB, v7x 64 MiB) with headroom
# ----------------------------------------------------------------------------
def _vmem_limit_bytes(c, hw_pad, feat_itemsize, hidden, chunk):
    try:
        cap = pltpu.get_tpu_info().vmem_capacity_bytes
    except Exception:
        cap = 64 << 20                      # conservative fallback
    budget = int(cap * 0.85)                # leave compiler-scratch headroom
    f32, bf16 = 4, 2
    slab = 2 * min(chunk, hw_pad)           # concatenated src+tgt chunk lanes
    streams = 4 * 2 * c * hw_pad * feat_itemsize            # 4 I/O blocks, 2x buffered
    weights = 2 * (hidden * c + hidden) * bf16               # W1 + w2_diff, 2x buffered
    temps = (6 * c * (slab // 2) * f32                       # per-chunk f32 temporaries
             + c * slab * (f32 + bf16)                       # concat slab f32 + bf16
             + hidden * slab * (f32 + bf16))                 # h f32 + bf16 copy
    stats = 2 * 8 * 128 * f32
    need = streams + weights + temps + stats + (4 << 20)     # + slack
    return int(min(max(need, 32 << 20), budget))


def fused_adain_da(src3d, tgt3d, w1_bf16, w2d_bf16, hw_real):
    n, c, hw_pad = src3d.shape
    hidden = w1_bf16.shape[0]
    feat_dtype = src3d.dtype

    img_spec = pl.BlockSpec((1, c, hw_pad), lambda i: (i, 0, 0))
    kernel = functools.partial(_fused_adain_da_kernel, hw_real=hw_real, chunk=_CHUNK)

    out_shapes = (
        jax.ShapeDtypeStruct((n, c, hw_pad), feat_dtype),    # fake_source
        jax.ShapeDtypeStruct((n, c, hw_pad), feat_dtype),    # fake_target
        jax.ShapeDtypeStruct((n, 8, 128), jnp.float32),      # per-image partials
    )
    return pl.pallas_call(
        kernel,
        out_shape=out_shapes,
        grid_spec=pltpu.PrefetchScalarGridSpec(
            num_scalar_prefetch=0,
            grid=(n,),
            in_specs=[
                img_spec,                                       # source (1,C,HWp)
                img_spec,                                       # target (1,C,HWp)
                pl.BlockSpec((hidden, c), lambda i: (0, 0)),    # W1 (512,C) bf16
                pl.BlockSpec((1, hidden), lambda i: (0, 0)),    # W2[0]-W2[1] bf16
            ],
            out_specs=[img_spec, img_spec,
                       pl.BlockSpec((1, 8, 128), lambda i: (i, 0, 0))],
        ),
        compiler_params=pltpu.CompilerParams(
            dimension_semantics=("parallel",),
            vmem_limit_bytes=_vmem_limit_bytes(
                c, hw_pad, jnp.dtype(feat_dtype).itemsize, hidden, _CHUNK)),
    )(src3d, tgt3d, w1_bf16, w2d_bf16)


# ----------------------------------------------------------------------------
# Full forward (glue in plain JAX)
# ----------------------------------------------------------------------------
def adain_with_da_forward(source_feat, target_feat, w1, w2):
    # w1: (512, C) Conv1 weight (out, in) squeezed 1x1; w2: (2, 512) Conv2 weight.
    assert source_feat.shape == target_feat.shape, (
        "AdaIN statistic swap requires matching source/target shapes")
    N, C, H, W = source_feat.shape
    HW = H * W
    assert HW > 1, "unbiased variance requires H*W > 1"
    HW_pad = ((HW + 127) // 128) * 128       # lane-dense stores / aligned chunks

    src3d = source_feat.reshape(N, C, HW)
    tgt3d = target_feat.reshape(N, C, HW)
    if HW_pad != HW:
        pad = ((0, 0), (0, 0), (0, HW_pad - HW))
        src3d = jnp.pad(src3d, pad)
        tgt3d = jnp.pad(tgt3d, pad)

    w1_bf16 = w1.astype(jnp.bfloat16)
    w2d_bf16 = (w2[0:1, :] - w2[1:2, :]).astype(jnp.bfloat16)   # precomputed once

    fake_src, fake_tgt, stats = fused_adain_da(src3d, tgt3d, w1_bf16, w2d_bf16, HW)

    fake_source_feat = fake_src[:, :, :HW].reshape(N, C, H, W)
    fake_target_feat = fake_tgt[:, :, :HW].reshape(N, C, H, W)

    n_el = N * C * HW            # elements of the normalized tensors
    n_pix = N * HW               # pixels seen by nll_loss(reduction='mean')

    s3 = jnp.sum(stats[:, 0, 0])
    s4 = jnp.sum(stats[:, 1, 0])
    t3 = jnp.sum(stats[:, 2, 0])
    t4 = jnp.sum(stats[:, 3, 0])
    loss_s = jnp.sum(stats[:, 4, 0])
    loss_t = jnp.sum(stats[:, 5, 0])

    source_skews = jnp.abs(s3 / n_el)
    source_kurtoses = jnp.abs(s4 / n_el - 3.0)
    target_skews = jnp.abs(t3 / n_el)
    target_kurtoses = jnp.abs(t4 / n_el - 3.0)
    source_norm_loss = loss_s / n_pix
    target_norm_loss = loss_t / n_pix

    return (fake_source_feat, fake_target_feat,
            source_skews, target_skews,
            source_kurtoses, target_kurtoses,
            source_norm_loss, target_norm_loss)


# ----------------------------------------------------------------------------
# Pure-JAX reference (for correctness check only)
# ----------------------------------------------------------------------------
def _ref_forward(src, tgt, w1, w2):
    N, C, H, W = src.shape
    s = src.reshape(N, C, -1).astype(jnp.float32)
    t = tgt.reshape(N, C, -1).astype(jnp.float32)
    sm = s.mean(-1, keepdims=True)
    tm = t.mean(-1, keepdims=True)
    sv = jnp.var(s, axis=-1, keepdims=True, ddof=1)
    tv = jnp.var(t, axis=-1, keepdims=True, ddof=1)
    sn = (s - sm) / jnp.sqrt(sv + EPS)
    tn = (t - tm) / jnp.sqrt(tv + EPS)
    fake_s = (tn * jnp.sqrt(sv + EPS) + sm).reshape(src.shape)
    fake_t = (sn * jnp.sqrt(tv + EPS) + tm).reshape(tgt.shape)
    s_skew = jnp.abs(jnp.mean(sn ** 3))
    s_kurt = jnp.abs(jnp.mean(sn ** 4) - 3.0)
    t_skew = jnp.abs(jnp.mean(tn ** 3))
    t_kurt = jnp.abs(jnp.mean(tn ** 4) - 3.0)

    def da(xn, label):
        x = xn.reshape(N, C, H * W).transpose(0, 2, 1).reshape(-1, C)
        h = jnp.maximum(x @ w1.T, 0.0)      # 1x1 conv C->512
        sc = h @ w2.T                       # 1x1 conv 512->2
        lp = jax.nn.log_softmax(sc, axis=-1)
        return -jnp.mean(lp[:, label])

    return (fake_s, fake_t, s_skew, t_skew, s_kurt, t_kurt, da(sn, 1), da(tn, 0))


if __name__ == "__main__":
    HIDDEN = DA_HIDDEN        # 512, as implied by _ImageDA
    key = jax.random.PRNGKey(0)
    k1, k2, k3, k4 = jax.random.split(key, 4)

    names = ["fake_source_feat", "fake_target_feat", "source_skews",
             "target_skews", "source_kurtoses", "target_kurtoses",
             "source_norm_loss", "target_norm_loss"]
    loose = {"source_norm_loss", "target_norm_loss"}   # bf16 MXU in the DA head

    def run_case(N, C, H, W):
        kk1 = jax.random.fold_in(k1, H * W)
        kk2 = jax.random.fold_in(k2, H * W)
        src = jax.random.normal(kk1, (N, C, H, W), dtype=jnp.float32)
        tgt = jax.random.normal(kk2, (N, C, H, W), dtype=jnp.float32) * 1.5 + 0.3
        w1 = jax.random.normal(k3, (HIDDEN, C), dtype=jnp.float32) * 0.05   # Conv1
        w2 = jax.random.normal(k4, (2, HIDDEN), dtype=jnp.float32) * 0.05   # Conv2

        outs = jax.block_until_ready(adain_with_da_forward(src, tgt, w1, w2))
        refs = _ref_forward(src, tgt, w1, w2)
        for name, o, r in zip(names, outs, refs):
            rtol, atol = (2e-2, 2e-2) if name in loose else (1e-3, 1e-3)
            assert jnp.allclose(o, r, rtol=rtol, atol=atol), (
                f"mismatch in {name} ({N}x{C}x{H}x{W}): {o} vs {r}")

    run_case(2, 8, 16, 16)   # HW = 256  (multiple of 128, no padding path)
    run_case(2, 8, 15, 15)   # HW = 225  (padded to 256, exercises masking path)

    print("KERNEL_OK")
</pallas_src>

<mosaic_0001>
module attributes {stable_mosaic.version = 11 : i64} {
  func.func @_fused_adain_da_kernel(%arg0: i32, %arg1: memref<1x8x256xf32, #tpu.memory_space<vmem>>, %arg2: memref<1x8x256xf32, #tpu.memory_space<vmem>>, %arg3: memref<512x8xbf16, #tpu.memory_space<vmem>>, %arg4: memref<1x512xbf16, #tpu.memory_space<vmem>>, %arg5: memref<1x8x256xf32, #tpu.memory_space<vmem>>, %arg6: memref<1x8x256xf32, #tpu.memory_space<vmem>>, %arg7: memref<1x8x128xf32, #tpu.memory_space<vmem>>) attributes {dimension_semantics = [#tpu.dimension_semantics<parallel>], iteration_bounds = array<i64: 2>, scalar_prefetch = 0 : i64, scratch_operands = 0 : i64, tpu.core_type = #tpu.core_type<tc>, window_params = [{transform_indices = @transform_0, window_bounds = array<i64: 1, 8, 256>}, {transform_indices = @transform_1, window_bounds = array<i64: 1, 8, 256>}, {pipeline_mode = #tpu.pipeline_mode<synchronous>, transform_indices = @transform_2, window_bounds = array<i64: 512, 8>}, {pipeline_mode = #tpu.pipeline_mode<synchronous>, transform_indices = @transform_3, window_bounds = array<i64: 1, 512>}, {transform_indices = @transform_4, window_bounds = array<i64: 1, 8, 256>}, {transform_indices = @transform_5, window_bounds = array<i64: 1, 8, 256>}, {transform_indices = @transform_6, window_bounds = array<i64: 1, 8, 128>}]} {
    %cst = arith.constant 0.000000e+00 : f32
    %0 = vector.broadcast %cst : f32 to vector<8x1xf32>
    %cst_0 = arith.constant 0.000000e+00 : f32
    %1 = vector.broadcast %cst_0 : f32 to vector<8x1xf32>
    %cst_1 = arith.constant 0.000000e+00 : f32
    %2 = vector.broadcast %cst_1 : f32 to vector<8x1xf32>
    %cst_2 = arith.constant 0.000000e+00 : f32
    %3 = vector.broadcast %cst_2 : f32 to vector<8x1xf32>
    %c0 = arith.constant 0 : index
    %c0_3 = arith.constant 0 : index
    %c0_4 = arith.constant 0 : index
    %4 = vector.load %arg1[%c0, %c0_3, %c0_4] : memref<1x8x256xf32, #tpu.memory_space<vmem>>, vector<1x8x256xf32>
    %5 = vector.shape_cast %4 : vector<1x8x256xf32> to vector<8x256xf32>
    %c0_5 = arith.constant 0 : index
    %c0_6 = arith.constant 0 : index
    %c0_7 = arith.constant 0 : index
    %6 = vector.load %arg2[%c0_5, %c0_6, %c0_7] : memref<1x8x256xf32, #tpu.memory_space<vmem>>, vector<1x8x256xf32>
    %7 = vector.shape_cast %6 : vector<1x8x256xf32> to vector<8x256xf32>
    %cst_8 = arith.constant dense<0.000000e+00> : vector<8xf32>
    %8 = vector.multi_reduction <add>, %5, %cst_8 [1] : vector<8x256xf32> to vector<8xf32>
    %9 = vector.shape_cast %8 : vector<8xf32> to vector<8x1xf32>
    %10 = arith.addf %0, %9 : vector<8x1xf32>
    %11 = arith.mulf %5, %5 : vector<8x256xf32>
    %cst_9 = arith.constant dense<0.000000e+00> : vector<8xf32>
    %12 = vector.multi_reduction <add>, %11, %cst_9 [1] : vector<8x256xf32> to vector<8xf32>
    %13 = vector.shape_cast %12 : vector<8xf32> to vector<8x1xf32>
    %14 = arith.addf %1, %13 : vector<8x1xf32>
    %cst_10 = arith.constant dense<0.000000e+00> : vector<8xf32>
    %15 = vector.multi_reduction <add>, %7, %cst_10 [1] : vector<8x256xf32> to vector<8xf32>
    %16 = vector.shape_cast %15 : vector<8xf32> to vector<8x1xf32>
    %17 = arith.addf %2, %16 : vector<8x1xf32>
    %18 = arith.mulf %7, %7 : vector<8x256xf32>
    %cst_11 = arith.constant dense<0.000000e+00> : vector<8xf32>
    %19 = vector.multi_reduction <add>, %18, %cst_11 [1] : vector<8x256xf32> to vector<8xf32>
    %20 = vector.shape_cast %19 : vector<8xf32> to vector<8x1xf32>
    %21 = arith.addf %3, %20 : vector<8x1xf32>
    %cst_12 = arith.constant 3.906250e-03 : f32
    %22 = vector.broadcast %cst_12 : f32 to vector<8x1xf32>
    %23 = arith.mulf %10, %22 : vector<8x1xf32>
    %cst_13 = arith.constant 3.906250e-03 : f32
    %24 = vector.broadcast %cst_13 : f32 to vector<8x1xf32>
    %25 = arith.mulf %17, %24 : vector<8x1xf32>
    %26 = arith.mulf %10, %23 : vector<8x1xf32>
    %27 = arith.subf %14, %26 : vector<8x1xf32>
    %cst_14 = arith.constant 0.00392156886 : f32
    %28 = vector.broadcast %cst_14 : f32 to vector<8x1xf32>
    %29 = arith.mulf %27, %28 : vector<8x1xf32>
    %30 = arith.mulf %17, %25 : vector<8x1xf32>
    %31 = arith.subf %21, %30 : vector<8x1xf32>
    %cst_15 = arith.constant 0.00392156886 : f32
    %32 = vector.broadcast %cst_15 : f32 to vector<8x1xf32>
    %33 = arith.mulf %31, %32 : vector<8x1xf32>
    %cst_16 = arith.constant 9.99999974E-6 : f32
    %34 = vector.broadcast %cst_16 : f32 to vector<8x1xf32>
    %35 = arith.addf %29, %34 : vector<8x1xf32>
    %36 = math.rsqrt %35 : vector<8x1xf32>
    %cst_17 = arith.constant 9.99999974E-6 : f32
    %37 = vector.broadcast %cst_17 : f32 to vector<8x1xf32>
    %38 = arith.addf %33, %37 : vector<8x1xf32>
    %39 = math.rsqrt %38 : vector<8x1xf32>
    %cst_18 = arith.constant 9.99999974E-6 : f32
    %40 = vector.broadcast %cst_18 : f32 to vector<8x1xf32>
    %41 = arith.addf %29, %40 : vector<8x1xf32>
    %42 = arith.mulf %41, %36 : vector<8x1xf32>
    %cst_19 = arith.constant 9.99999974E-6 : f32
    %43 = vector.broadcast %cst_19 : f32 to vector<8x1xf32>
    %44 = arith.addf %33, %43 : vector<8x1xf32>
    %45 = arith.mulf %44, %39 : vector<8x1xf32>
    %c0_20 = arith.constant 0 : index
    %c0_21 = arith.constant 0 : index
    %46 = vector.load %arg3[%c0_20, %c0_21] : memref<512x8xbf16, #tpu.memory_space<vmem>>, vector<512x8xbf16>
    %c0_22 = arith.constant 0 : index
    %c0_23 = arith.constant 0 : index
    %47 = vector.load %arg4[%c0_22, %c0_23] : memref<1x512xbf16, #tpu.memory_space<vmem>>, vector<1x512xbf16>
    %c0_24 = arith.constant 0 : index
    %c0_25 = arith.constant 0 : index
    %c0_26 = arith.constant 0 : index
    %48 = vector.load %arg1[%c0_24, %c0_25, %c0_26] : memref<1x8x256xf32, #tpu.memory_space<vmem>>, vector<1x8x256xf32>
    %49 = vector.shape_cast %48 : vector<1x8x256xf32> to vector<8x256xf32>
    %c0_27 = arith.constant 0 : index
    %c0_28 = arith.constant 0 : index
    %c0_29 = arith.constant 0 : index
    %50 = vector.load %arg2[%c0_27, %c0_28, %c0_29] : memref<1x8x256xf32, #tpu.memory_space<vmem>>, vector<1x8x256xf32>
    %51 = vector.shape_cast %50 : vector<1x8x256xf32> to vector<8x256xf32>
    %52 = vector.broadcast %23 : vector<8x1xf32> to vector<8x256xf32>
    %53 = arith.subf %49, %52 : vector<8x256xf32>
    %54 = vector.broadcast %36 : vector<8x1xf32> to vector<8x256xf32>
    %55 = arith.mulf %53, %54 : vector<8x256xf32>
    %56 = vector.broadcast %25 : vector<8x1xf32> to vector<8x256xf32>
    %57 = arith.subf %51, %56 : vector<8x256xf32>
    %58 = vector.broadcast %39 : vector<8x1xf32> to vector<8x256xf32>
    %59 = arith.mulf %57, %58 : vector<8x256xf32>
    %60 = vector.broadcast %42 : vector<8x1xf32> to vector<8x256xf32>
    %61 = arith.mulf %59, %60 : vector<8x256xf32>
    %62 = vector.broadcast %23 : vector<8x1xf32> to vector<8x256xf32>
    %63 = arith.addf %61, %62 : vector<8x256xf32>
    %c0_30 = arith.constant 0 : index
    %c0_31 = arith.constant 0 : index
    %c0_32 = arith.constant 0 : index
    %64 = vector.load %arg5[%c0_30, %c0_31, %c0_32] : memref<1x8x256xf32, #tpu.memory_space<vmem>>, vector<1x8x256xf32>
    %65 = vector.shape_cast %64 : vector<1x8x256xf32> to vector<8x256xf32>
    %66 = vector.shape_cast %63 : vector<8x256xf32> to vector<1x8x256xf32>
    tpu.vector_store %arg5[%c0_30, %c0_31, %c0_32], %66 {strides = array<i32>} : memref<1x8x256xf32, #tpu.memory_space<vmem>>, vector<1x8x256xf32>,
    %67 = vector.broadcast %45 : vector<8x1xf32> to vector<8x256xf32>
    %68 = arith.mulf %55, %67 : vector<8x256xf32>
    %69 = vector.broadcast %25 : vector<8x1xf32> to vector<8x256xf32>
    %70 = arith.addf %68, %69 : vector<8x256xf32>
    %c0_33 = arith.constant 0 : index
    %c0_34 = arith.constant 0 : index
    %c0_35 = arith.constant 0 : index
    %71 = vector.load %arg6[%c0_33, %c0_34, %c0_35] : memref<1x8x256xf32, #tpu.memory_space<vmem>>, vector<1x8x256xf32>
    %72 = vector.shape_cast %71 : vector<1x8x256xf32> to vector<8x256xf32>
    %73 = vector.shape_cast %70 : vector<8x256xf32> to vector<1x8x256xf32>
    tpu.vector_store %arg6[%c0_33, %c0_34, %c0_35], %73 {strides = array<i32>} : memref<1x8x256xf32, #tpu.memory_space<vmem>>, vector<1x8x256xf32>,
    %74 = arith.mulf %55, %55 : vector<8x256xf32>
    %75 = arith.mulf %59, %59 : vector<8x256xf32>
    %76 = arith.mulf %74, %55 : vector<8x256xf32>
    %77 = vector.shape_cast %76 : vector<8x256xf32> to vector<1x8x256xf32>
    %cst_36 = arith.constant dense<0.000000e+00> : vector<1xf32>
    %78 = vector.multi_reduction <add>, %77, %cst_36 [1, 2] : vector<1x8x256xf32> to vector<1xf32>
    %79 = vector.shape_cast %78 : vector<1xf32> to vector<1x1x1xf32>
    %80 = vector.extract %79[0, 0, 0] : f32 from vector<1x1x1xf32>
    %cst_37 = arith.constant 0.000000e+00 : f32
    %81 = arith.addf %cst_37, %80 : f32
    %82 = arith.mulf %74, %74 : vector<8x256xf32>
    %83 = vector.shape_cast %82 : vector<8x256xf32> to vector<1x8x256xf32>
    %cst_38 = arith.constant dense<0.000000e+00> : vector<1xf32>
    %84 = vector.multi_reduction <add>, %83, %cst_38 [1, 2] : vector<1x8x256xf32> to vector<1xf32>
    %85 = vector.shape_cast %84 : vector<1xf32> to vector<1x1x1xf32>
    %86 = vector.extract %85[0, 0, 0] : f32 from vector<1x1x1xf32>
    %cst_39 = arith.constant 0.000000e+00 : f32
    %87 = arith.addf %cst_39, %86 : f32
    %88 = arith.mulf %75, %59 : vector<8x256xf32>
    %89 = vector.shape_cast %88 : vector<8x256xf32> to vector<1x8x256xf32>
    %cst_40 = arith.constant dense<0.000000e+00> : vector<1xf32>
    %90 = vector.multi_reduction <add>, %89, %cst_40 [1, 2] : vector<1x8x256xf32> to vector<1xf32>
    %91 = vector.shape_cast %90 : vector<1xf32> to vector<1x1x1xf32>
    %92 = vector.extract %91[0, 0, 0] : f32 from vector<1x1x1xf32>
    %cst_41 = arith.constant 0.000000e+00 : f32
    %93 = arith.addf %cst_41, %92 : f32
    %94 = arith.mulf %75, %75 : vector<8x256xf32>
    %95 = vector.shape_cast %94 : vector<8x256xf32> to vector<1x8x256xf32>
    %cst_42 = arith.constant dense<0.000000e+00> : vector<1xf32>
    %96 = vector.multi_reduction <add>, %95, %cst_42 [1, 2] : vector<1x8x256xf32> to vector<1xf32>
    %97 = vector.shape_cast %96 : vector<1xf32> to vector<1x1x1xf32>
    %98 = vector.extract %97[0, 0, 0] : f32 from vector<1x1x1xf32>
    %cst_43 = arith.constant 0.000000e+00 : f32
    %99 = arith.addf %cst_43, %98 : f32
    %100 = tpu.concatenate %55, %59 in 1 : vector<8x256xf32>, vector<8x256xf32> -> vector<8x512xf32>
    %101 = arith.truncf %100 : vector<8x512xf32> to vector<8x512xbf16>
    %cst_44 = arith.constant dense<0.000000e+00> : vector<512x512xf32>
    %102 = tpu.matmul %46, %101, %cst_44 {dimension_numbers = #tpu.dot_dimension_numbers<[1], [0], [0], [1], [0, 0, 1, 1], [], []>} : vector<512x8xbf16>, vector<8x512xbf16>, vector<512x512xf32> -> vector<512x512xf32>
    %cst_45 = arith.constant 0.000000e+00 : f32
    %103 = vector.broadcast %cst_45 : f32 to vector<512x512xf32>
    %104 = arith.maximumf %102, %103 : vector<512x512xf32>
    %105 = arith.truncf %104 : vector<512x512xf32> to vector<512x512xbf16>
    %cst_46 = arith.constant dense<0.000000e+00> : vector<1x512xf32>
    %106 = tpu.matmul %47, %105, %cst_46 {dimension_numbers = #tpu.dot_dimension_numbers<[1], [0], [0], [1], [0, 0, 1, 1], [], []>} : vector<1x512xbf16>, vector<512x512xbf16>, vector<1x512xf32> -> vector<1x512xf32>
    %107 = vector.extract_strided_slice %106 {offsets = [0, 0], sizes = [1, 256], strides = [1, 1]} : vector<1x512xf32> to vector<1x256xf32>
    %cst_47 = arith.constant 0.000000e+00 : f32
    %108 = vector.broadcast %cst_47 : f32 to vector<1x256xf32>
    %109 = arith.maximumf %107, %108 : vector<1x256xf32>
    %110 = math.absf %107 : vector<1x256xf32>
    %cst_48 = arith.constant 0.000000e+00 : f32
    %111 = vector.broadcast %cst_48 : f32 to vector<1x256xf32>
    %112 = arith.subf %111, %110 : vector<1x256xf32>
    %113 = math.exp %112 : vector<1x256xf32>
    %cst_49 = arith.constant 1.000000e+00 : f32
    %114 = vector.broadcast %cst_49 : f32 to vector<1x256xf32>
    %115 = arith.addf %114, %113 : vector<1x256xf32>
    %116 = math.log %115 : vector<1x256xf32>
    %117 = arith.addf %109, %116 : vector<1x256xf32>
    %118 = vector.extract_strided_slice %106 {offsets = [0, 256], sizes = [1, 256], strides = [1, 1]} : vector<1x512xf32> to vector<1x256xf32>
    %cst_50 = arith.constant 0.000000e+00 : f32
    %119 = vector.broadcast %cst_50 : f32 to vector<1x256xf32>
    %120 = arith.subf %119, %118 : vector<1x256xf32>
    %cst_51 = arith.constant 0.000000e+00 : f32
    %121 = vector.broadcast %cst_51 : f32 to vector<1x256xf32>
    %122 = arith.maximumf %120, %121 : vector<1x256xf32>
    %123 = math.absf %120 : vector<1x256xf32>
    %cst_52 = arith.constant 0.000000e+00 : f32
    %124 = vector.broadcast %cst_52 : f32 to vector<1x256xf32>
    %125 = arith.subf %124, %123 : vector<1x256xf32>
    %126 = math.exp %125 : vector<1x256xf32>
    %cst_53 = arith.constant 1.000000e+00 : f32
    %127 = vector.broadcast %cst_53 : f32 to vector<1x256xf32>
    %128 = arith.addf %127, %126 : vector<1x256xf32>
    %129 = math.log %128 : vector<1x256xf32>
    %130 = arith.addf %122, %129 : vector<1x256xf32>
    %131 = vector.shape_cast %117 : vector<1x256xf32> to vector<1x1x256xf32>
    %cst_54 = arith.constant dense<0.000000e+00> : vector<1xf32>
    %132 = vector.multi_reduction <add>, %131, %cst_54 [1, 2] : vector<1x1x256xf32> to vector<1xf32>
    %133 = vector.shape_cast %132 : vector<1xf32> to vector<1x1x1xf32>
    %134 = vector.extract %133[0, 0, 0] : f32 from vector<1x1x1xf32>
    %cst_55 = arith.constant 0.000000e+00 : f32
    %135 = arith.addf %cst_55, %134 : f32
    %136 = vector.shape_cast %130 : vector<1x256xf32> to vector<1x1x256xf32>
    %cst_56 = arith.constant dense<0.000000e+00> : vector<1xf32>
    %137 = vector.multi_reduction <add>, %136, %cst_56 [1, 2] : vector<1x1x256xf32> to vector<1xf32>
    %138 = vector.shape_cast %137 : vector<1xf32> to vector<1x1x1xf32>
    %139 = vector.extract %138[0, 0, 0] : f32 from vector<1x1x1xf32>
    %cst_57 = arith.constant 0.000000e+00 : f32
    %140 = arith.addf %cst_57, %139 : f32
    %141 = tpu.iota {dimensions = array<i32: 0>} : vector<8x128xi32>
    %c0_i32 = arith.constant 0 : i32
    %142 = vector.broadcast %c0_i32 : i32 to vector<8x128xi32>
    %143 = arith.cmpi eq, %141, %142 : vector<8x128xi32>
    %c1_i32 = arith.constant 1 : i32
    %144 = vector.broadcast %c1_i32 : i32 to vector<8x128xi32>
    %145 = arith.cmpi eq, %141, %144 : vector<8x128xi32>
    %c2_i32 = arith.constant 2 : i32
    %146 = vector.broadcast %c2_i32 : i32 to vector<8x128xi32>
    %147 = arith.cmpi eq, %141, %146 : vector<8x128xi32>
    %c3_i32 = arith.constant 3 : i32
    %148 = vector.broadcast %c3_i32 : i32 to vector<8x128xi32>
    %149 = arith.cmpi eq, %141, %148 : vector<8x128xi32>
    %c4_i32 = arith.constant 4 : i32
    %150 = vector.broadcast %c4_i32 : i32 to vector<8x128xi32>
    %151 = arith.cmpi eq, %141, %150 : vector<8x128xi32>
    %c5_i32 = arith.constant 5 : i32
    %152 = vector.broadcast %c5_i32 : i32 to vector<8x128xi32>
    %153 = arith.cmpi eq, %141, %152 : vector<8x128xi32>
    %cst_58 = arith.constant 0.000000e+00 : f32
    %154 = vector.broadcast %140 : f32 to vector<8x128xf32>
    %155 = vector.broadcast %cst_58 : f32 to vector<8x128xf32>
    %156 = arith.select %153, %154, %155 : vector<8x128xi1>, vector<8x128xf32>
    %157 = vector.broadcast %135 : f32 to vector<8x128xf32>
    %158 = arith.select %151, %157, %156 : vector<8x128xi1>, vector<8x128xf32>
    %159 = vector.broadcast %99 : f32 to vector<8x128xf32>
    %160 = arith.select %149, %159, %158 : vector<8x128xi1>, vector<8x128xf32>
    %161 = vector.broadcast %93 : f32 to vector<8x128xf32>
    %162 = arith.select %147, %161, %160 : vector<8x128xi1>, vector<8x128xf32>
    %163 = vector.broadcast %87 : f32 to vector<8x128xf32>
    %164 = arith.select %145, %163, %162 : vector<8x128xi1>, vector<8x128xf32>
    %165 = vector.broadcast %81 : f32 to vector<8x128xf32>
    %166 = arith.select %143, %165, %164 : vector<8x128xi1>, vector<8x128xf32>
    %c0_59 = arith.constant 0 : index
    %c0_60 = arith.constant 0 : index
    %c0_61 = arith.constant 0 : index
    %167 = vector.load %arg7[%c0_59, %c0_60, %c0_61] : memref<1x8x128xf32, #tpu.memory_space<vmem>>, vector<1x8x128xf32>
    %168 = vector.shape_cast %167 : vector<1x8x128xf32> to vector<8x128xf32>
    %169 = vector.shape_cast %166 : vector<8x128xf32> to vector<1x8x128xf32>
    tpu.vector_store %arg7[%c0_59, %c0_60, %c0_61], %169 {strides = array<i32>} : memref<1x8x128xf32, #tpu.memory_space<vmem>>, vector<1x8x128xf32>,
    return
  }
  func.func @transform_0(%arg0: i32) -> (i32, i32, i32) {
    %c0_i32 = arith.constant 0 : i32
    %c0_i32_0 = arith.constant 0 : i32
    %c0_i32_1 = arith.constant 0 : i32
    return %arg0, %c0_i32, %c0_i32_0 : i32, i32, i32
  }
  func.func @transform_1(%arg0: i32) -> (i32, i32, i32) {
    %c0_i32 = arith.constant 0 : i32
    %c0_i32_0 = arith.constant 0 : i32
    %c0_i32_1 = arith.constant 0 : i32
    return %arg0, %c0_i32, %c0_i32_0 : i32, i32, i32
  }
  func.func @transform_2(%arg0: i32) -> (i32, i32) {
    %c0_i32 = arith.constant 0 : i32
    %c0_i32_0 = arith.constant 0 : i32
    %c0_i32_1 = arith.constant 0 : i32
    return %c0_i32, %c0_i32_0 : i32, i32
  }
  func.func @transform_3(%arg0: i32) -> (i32, i32) {
    %c0_i32 = arith.constant 0 : i32
    %c0_i32_0 = arith.constant 0 : i32
    %c0_i32_1 = arith.constant 0 : i32
    return %c0_i32, %c0_i32_0 : i32, i32
  }
  func.func @transform_4(%arg0: i32) -> (i32, i32, i32) {
    %c0_i32 = arith.constant 0 : i32
    %c0_i32_0 = arith.constant 0 : i32
    %c0_i32_1 = arith.constant 0 : i32
    return %arg0, %c0_i32, %c0_i32_0 : i32, i32, i32
  }
  func.func @transform_5(%arg0: i32) -> (i32, i32, i32) {
    %c0_i32 = arith.constant 0 : i32
    %c0_i32_0 = arith.constant 0 : i32
    %c0_i32_1 = arith.constant 0 : i32
    return %arg0, %c0_i32, %c0_i32_0 : i32, i32, i32
  }
  func.func @transform_6(%arg0: i32) -> (i32, i32, i32) {
    %c0_i32 = arith.constant 0 : i32
    %c0_i32_0 = arith.constant 0 : i32
    %c0_i32_1 = arith.constant 0 : i32
    return %arg0, %c0_i32, %c0_i32_0 : i32, i32, i32
  }
}

</mosaic_0001>

<bundles_post_ra>
// kernel: tpu_custom_call.1
= control target key start
LH: loop header
LB: loop body
LE: loop exit
PB: predicated region body
PF: predicated region fallthrough
CT: control target
= control target key end

     0   :  { %12 = vsyncpa [#allocation3], 0  ;;  %s3628_s0 = inlined_call_operand.vmem [shape: f32[2,8,256], index: 0, kind: input, shape index: {}]   ;;  %s3629_s1 = inlined_call_operand.vmem [shape: f32[2,8,256], index: 1, kind: input, shape index: {}]   ;;  %s3630_s2 = inlined_call_operand.vmem [shape: bf16[512,8], index: 2, kind: input, shape index: {}]   ;;  %s3631_s3 = inlined_call_operand.vmem [shape: bf16[1,512], index: 3, kind: input, shape index: {}]   ;;  %s3632_s4 = inlined_call_operand.hbm [shape: f32[2,8,256], index: 4, kind: output, shape index: {0}]   ;;  %s3633_s5 = inlined_call_operand.hbm [shape: f32[2,8,256], index: 5, kind: output, shape index: {1}]   ;;  %s3634_s6 = inlined_call_operand.hbm [shape: f32[2,8,128], index: 6, kind: output, shape index: {2}]  }
   0x1   :  { %14 = vsyncpa [#allocation3 + $0x1], 0 }
   0x2   :  { %15 = vsyncpa [#allocation5], 0 }
   0x3   :  { %17 = vsyncpa [#allocation5 + $0x1], 0  ;;  %s2692_s21 = smov 0   ;;  %s2694_s22 = smov 0  }
   0x4   :  { %s2696_s23 = smov 0   ;;  %s2698_s24 = smov 0  }
   0x5 LB: > { %s2713_s25 = sadd.s32 4294967295, %s2650_s24   ;;  %s3644_s26 = sadd.s32 4294967294, %s2650_s24   ;;  %s2650_s24 = sphi %s2698_s24, %s3773_s24   ;;  %s2646_s23 = sphi %s2696_s23, %s3772_s23   ;;  %s2642_s22 = sphi %s2694_s22, %s3771_s22   ;;  %s2638_s21 = sphi %s2692_s21, %s3770_s21  }
   0x6   : > { %s2717_s27 = sadd.s32 1, %s2650_s24   ;;  %s124_s28 = sadd.s32 1, %s2646_s23 }
   0x7   : > { %s121_s29 = ssub.s32 %s2650_s24, %s2717_s27  ;;  %p134_p0 = scmp.ne.s32.totalorder %s2646_s23, %s2642_s22 }
   0x8   : > { %p122_p1 = scmp.eq.s32.totalorder %s121_s29, 0  ;;  %p135_p2 = scmp.eq.s32.totalorder %s2713_s25, 1 }
   0x9   : > { %p140_p3 = scmp.ne.s32.totalorder %s2642_s22, %s2638_s21  ;;  %p141_p4 = scmp.eq.s32.totalorder %s3644_s26, 1 }
   0xa   : > { %s2730_s30 = scalar_select %p122_p1, %s2646_s23, %s124_s28  }
   0xb   : > { %p2732_p5 = por %p135_p2, %p134_p0  ;;  %p2736_p6 = por %p141_p4, %p140_p3 }
   0xc   : > { %p2298_p7 = scmp.ge.s32.totalorder %s2650_s24, 1  ;;  %p233_p8 = scmp.lt.s32.totalorder %s2650_s24, 3 }
   0xe   : > { %p234_p9 = pnand %p2298_p7, %p233_p8 }
  0x10   : > { %237 = sbr.rel (%p234_p9) target bundleno = 1210 (0x4ba), region = 36 }
  0x15   : > { %p278_p10 = scmp.lt.s32.totalorder %s2713_s25, 1  ;;  %v2652_v12 = vmov 0   ;;  %s2758_s17 = sand.u32 1, %s2642_s22   ;;  %vm729_vm0 = vcmask 1043456   ;;  %vm632_vm1 = vcmask 64512   ;;  %v2482_v54 = vld [vmem:[%s3630_s2] sm:$0xff]  }
  0x16   : > { %774 = vmatprep.mubr.bf16.mxu0 %v2652_v12  ;;  %1127 = vmatprep.mubr.bf16.mxu1 %v2652_v12  ;;  %s2299_s18 = sshll.u32 %s2758_s17, 4  ;;  %vm2063_vm2 = vcmask 1040384   ;;  %s2116_s19 = sand.u32 1, %s2713_s25  }
  0x17   : > { %s279_s9 = scalar_select %p278_p10, %s2713_s25, 1 }
  0x18   : > { %s2770_s28 = scalar_lea.vmem [#allocation2], %s2299_s18  ;;  %s2782_s29 = scalar_lea.vmem [#allocation4], %s2299_s18 }
  0x19   : > { %s2415_s10 = sshll.u32 %s279_s9, 4  ;;  %s2417_s20 = sshll.u32 %s2713_s25, 8 }
  0x1a   : > { %s287_s13 = scalar_lea.vmem %s3629_s1, %s2415_s10  ;;  %s282_s16 = scalar_lea.vmem %s3628_s0, %s2415_s10 }
  0x1b   : > { %v291_v0 = vld [vmem:[%s287_s13] sm:$0xff]  ;;  %v292_v1 = vld [vmem:[%s287_s13 + $0x8] sm:$0xff]  ;;  %s3540_s11 = scalar_lea.hbm %s3633_s5, %s2417_s20  ;;  %s2150_s12 = sshll.u32 %s2782_s29, 4  ;;  %s2151_s12 = int_to_ptr.vmem [resolvable:$true] %s2150_s12 }
  0x1c   : > { %v289_v2 = vld [vmem:[%s282_s16] sm:$0xff]  ;;  %v303_v3 = vadd.f32 %v292_v1, %v291_v0  ;;  %v290_v4 = vld [vmem:[%s282_s16 + $0x8] sm:$0xff]  ;;  %v307_v5 = vmul.f32 %v291_v0, %v291_v0  ;;  %v308_v6 = vmul.f32 %v292_v1, %v292_v1  ;;  %s3546_s15 = scalar_lea.hbm %s3632_s4, %s2417_s20  ;;  %s3548_s16 = scalar_lea.sflag [#allocation5], %s2116_s19 }
  0x1d   : > { %v297_v7 = vmul.f32 %v289_v2, %v289_v2  ;;  %v293_v8 = vadd.f32 %v290_v4, %v289_v2  ;;  %v298_v9 = vmul.f32 %v290_v4, %v290_v4  ;;  %s2534_s18 = scalar_lea.vmem %s2151_s12, 256  ;;  %s2654_s26 = smov [#allocation4]  }
  0x1e   : > { %304 = vadd.xlane.f32.xlu1 %v303_v3  ;;  %v309_v10 = vadd.f32 %v308_v6, %v307_v5  ;;  %v2483_v6 = vld [vmem:[%s3630_s2 + $0x8] sm:$0xff]   ;;  %p2535_p11 = scmp.ne.s32.totalorder %s2151_s12, %s2534_s18  ;;  %s2538_s9 = sshll.u32 %s2654_s26, 4  ;;  %s2539_s9 = int_to_ptr.vmem [resolvable:$false] %s2538_s9 }
  0x1f   : > { %294 = vadd.xlane.f32.xlu0 %v293_v8  ;;  %v299_v11 = vadd.f32 %v298_v9, %v297_v7  ;;  %v2484_v7 = vld [vmem:[%s3630_s2 + $0x10] sm:$0xff]   ;;  %v2485_v8 = vld [vmem:[%s3630_s2 + $0x18] sm:$0xff]   ;;  %v2486_v9 = vld [vmem:[%s3630_s2 + $0x20] sm:$0xff]   ;;  %s2540_s10 = scalar_lea.vmem %s2539_s9, 512  ;;  %p2541_p0 = scmp.lt.s32.totalorder %s2151_s12, %s2539_s9 }
  0x20   : > { %p2536_p12 = pnand %p2535_p11, %p2732_p5  ;;  %p2542_p1 = scmp.lt.s32.totalorder %s2540_s10, %s2534_s18 }
  0x22   : > { %310 = vadd.xlane.f32.xlu1 %v309_v10  ;;  %v2487_v10 = vld [vmem:[%s3630_s2 + $0x28] sm:$0xff]   ;;  %p2537_p13 = pneg %p2536_p12  ;;  %p2543_p2 = por %p2542_p1, %p2541_p0 }
  0x23   : > { %300 = vadd.xlane.f32.xlu0 %v299_v11  ;;  %v2488_v11 = vld [vmem:[%s3630_s2 + $0x30] sm:$0xff]  }
  0x24   : > { %p2544_p3 = pnand %p2543_p2, %p2537_p13 }
  0xa7   : > { %v305_v13 = vpop.xlane.xlu1 %304 }
  0xa8   : > { %v2752_v14 = vmul.f32 0.00390625, %v305_v13  ;;  %v295_v15 = vpop.xlane.xlu0 %294 }
  0xa9   : > { %v313_v16 = vmul.f32 0.00390625, %v295_v15 }
  0xaa   : > { %v318_v17 = vmul.f32 %v2752_v14, %v305_v13  ;;  %v396_v27 = vsub.f32 %v291_v0, %v2752_v14  ;;  %v397_v28 = vsub.f32 %v292_v1, %v2752_v14  ;;  %v2489_v13 = vld [vmem:[%s3630_s2 + $0x38] sm:$0xff]  }
  0xab   : > { %v315_v18 = vmul.f32 %v313_v16, %v295_v15  ;;  %v311_v19 = vpop.xlane.xlu1 %310  ;;  %v393_v30 = vsub.f32 %v290_v4, %v313_v16  ;;  %v392_v31 = vsub.f32 %v289_v2, %v313_v16  ;;  %v2491_v15 = vld [vmem:[%s3630_s2 + $0x48] sm:$0xff]  }
  0xac   : > { %v319_v20 = vsub.f32 %v311_v19, %v318_v17  ;;  %v301_v21 = vpop.xlane.xlu0 %300  ;;  %v2493_v17 = vld [vmem:[%s3630_s2 + $0x58] sm:$0xff]   ;;  %v2495_v19 = vld [vmem:[%s3630_s2 + $0x68] sm:$0xff]  }
  0xad   : > { %v316_v22 = vsub.f32 %v301_v21, %v315_v18  ;;  %v2494_v18 = vld [vmem:[%s3630_s2 + $0x60] sm:$0xff]   ;;  %v2497_v21 = vld [vmem:[%s3630_s2 + $0x78] sm:$0xff]  }
  0xae   : > { %v320_v23 = vmul.f32 0.003921569, %v319_v20  ;;  %v2496_v20 = vld [vmem:[%s3630_s2 + $0x70] sm:$0xff]  }
  0xaf   : > { %v317_v24 = vmul.f32 0.003921569, %v316_v22  ;;  %v2498_v22 = vld [vmem:[%s3630_s2 + $0x80] sm:$0xff]  }
  0xb0   : > { %v323_v25 = vadd.f32 1e-05, %v320_v23  ;;  %v2499_v23 = vld [vmem:[%s3630_s2 + $0x88] sm:$0xff]  }
  0xb1   : > { %v321_v26 = vadd.f32 1e-05, %v317_v24 }
  0xb2   : > { %2514 = vrsqrt.f32 %v323_v25 }
  0xb3   : > { %2516 = vrsqrt.f32 %v321_v26 }
  0xbf   : > { %v2515_v29 = vpop.eup %2514 }
  0xc0   : > { %v2517_v32 = vpop.eup %2516  ;;  %v398_v33 = vmul.f32 %v2515_v29, %v396_v27  ;;  %v399_v34 = vmul.f32 %v2515_v29, %v397_v28  ;;  %v326_v35 = vmul.f32 %v2515_v29, %v323_v25  ;;  %v2500_v28 = vld [vmem:[%s3630_s2 + $0x90] sm:$0xff]  }
  0xc1   : > { %v325_v36 = vmul.f32 %v2517_v32, %v321_v26  ;;  %v395_v37 = vmul.f32 %v2517_v32, %v393_v30  ;;  %v394_v38 = vmul.f32 %v2517_v32, %v392_v31 }
  0xc2   : > { %v471_v39 = vpack.c.bf16 %v399_v34, %v399_v34  ;;  %v470_v40 = vpack.c.bf16 %v398_v33, %v398_v33  ;;  %v414_v41 = vmul.f32 %v398_v33, %v398_v33  ;;  %v415_v42 = vmul.f32 %v399_v34, %v399_v34 }
  0xc3   : > { %v400_v43 = vmul.f32 %v398_v33, %v325_v36  ;;  %v401_v44 = vmul.f32 %v399_v34, %v325_v36  ;;  %v469_v45 = vpack.c.bf16 %v395_v37, %v395_v37  ;;  %v468_v46 = vpack.c.bf16 %v394_v38, %v394_v38 }
  0xc4   : > { %v412_v47 = vmul.f32 %v394_v38, %v394_v38  ;;  %v413_v48 = vmul.f32 %v395_v37, %v395_v37  ;;  %2371 = vmatprep.subr.msk.bf16.mxu1 %vm729_vm0, %v471_v39  ;;  %v737_v49 = vsel %vm729_vm0, %v470_v40, 0  ;;  %v442_v50 = vmul.f32 %v414_v41, %v398_v33 }
  0xc5   : > { %v402_v51 = vadd.f32 %v400_v43, %v313_v16  ;;  %v403_v52 = vadd.f32 %v401_v44, %v313_v16  ;;  %2338 = vmatprep.subr.msk.bf16.mxu0 %vm729_vm0, %v469_v45  ;;  %v731_v53 = vsel %vm729_vm0, %v468_v46, 0  ;;  %1110 = vmatpush1.bf16.msra.mxu1 %v737_v49  ;;  %v443_v55 = vmul.f32 %v415_v42, %v399_v34  ;;  %v2492_v16 = vld [vmem:[%s3630_s2 + $0x50] sm:$0xff]   ;;  %v2501_v45 = vld [vmem:[%s3630_s2 + $0x98] sm:$0xff]  }
  0xc6   : > { %757 = vmatpush1.bf16.msra.mxu0 %v731_v53  ;;  %v429_v56 = vmul.f32 %v412_v47, %v412_v47  ;;  %v430_v57 = vmul.f32 %v413_v48, %v413_v48  ;;  %v416_v58 = vmul.f32 %v412_v47, %v394_v38  ;;  %v417_v59 = vmul.f32 %v413_v48, %v395_v37 }
  0xc7   : > { %v455_v60 = vmul.f32 %v414_v41, %v414_v41  ;;  %v456_v61 = vmul.f32 %v415_v42, %v415_v42  ;;  %v406_v62 = vmul.f32 %v394_v38, %v326_v35  ;;  %404 = vst [vmem:[%s2770_s28] sm:$0xff] %v402_v51  ;;  %405 = vst [vmem:[%s2770_s28 + $0x8] sm:$0xff] %v403_v52 }
  0xc8   : > { %v431_v63 = vadd.f32 %v430_v57, %v429_v56  ;;  %v418_v0 = vadd.f32 %v417_v59, %v416_v58  ;;  %2372 = vmatmul.mubr.msk.bf16.vlgmr.msra.gmra.mxu1 %vm632_vm1, %v2482_v54  ;;  %v407_v1 = vmul.f32 %v395_v37, %v326_v35  ;;  %v444_v3 = vadd.f32 %v443_v55, %v442_v50  ;;  %v2503_v55 = vld [vmem:[%s3630_s2 + $0xa8] sm:$0xff]   ;;  %v2504_v56 = vld [vmem:[%s3630_s2 + $0xb0] sm:$0xff]   ;;  %v2505_v57 = vld [vmem:[%s3630_s2 + $0xb8] sm:$0xff]  }
  0xc9   : > { %2339 = vmatmul.mubr.msk.bf16.vlgmr.msra.gmra.mxu0 %vm632_vm1, %v2482_v54  ;;  %1137 = vmatprep.mubr.bf16.mxu1 %v2652_v12  ;;  %v408_v2 = vadd.f32 %v406_v62, %v2752_v14  ;;  %v457_v4 = vadd.f32 %v456_v61, %v455_v60  ;;  %v2502_v54 = vld [vmem:[%s3630_s2 + $0xa0] sm:$0xff]  }
  0xca   : > { %432 = vadd.xlane.f32.xlu1 %v431_v63  ;;  %419 = vadd.xlane.f32.xlu0 %v418_v0  ;;  %v409_v5 = vadd.f32 %v407_v1, %v2752_v14  ;;  %v2490_v14 = vld [vmem:[%s3630_s2 + $0x40] sm:$0xff]  }
  0xcb   : > { %784 = vmatprep.mubr.bf16.mxu0 %v2652_v12  ;;  %410 = vst [vmem:[%s2782_s29] sm:$0xff] %v408_v2  ;;  %v2506_v58 = vld [vmem:[%s3630_s2 + $0xc0] sm:$0xff]   ;;  %v2507_v2 = vld [vmem:[%s3630_s2 + $0xc8] sm:$0xff]  }
  0xcc   : > { %411 = vst [vmem:[%s2782_s29 + $0x8] sm:$0xff] %v409_v5 }
  0xce   : > { %445 = vadd.xlane.f32.xlu0 %v444_v3  ;;  %458 = vadd.xlane.f32.xlu1 %v457_v4 }
  0xd0   : > { %2373 = vmatmul.mubr.msk.bf16.gmra.mxu1 %vm632_vm1, %v2483_v6 }
  0xd1   : > { %2340 = vmatmul.mubr.msk.bf16.gmra.mxu0 %vm632_vm1, %v2483_v6  ;;  %1147 = vmatprep.mubr.bf16.mxu1 %v2652_v12 }
  0xd2   : > { %794 = vmatprep.mubr.bf16.mxu0 %v2652_v12 }
  0xd8   : > { %2374 = vmatmul.mubr.msk.bf16.gmra.mxu1 %vm632_vm1, %v2484_v7 }
  0xd9   : > { %2341 = vmatmul.mubr.msk.bf16.gmra.mxu0 %vm632_vm1, %v2484_v7  ;;  %1157 = vmatprep.mubr.bf16.mxu1 %v2652_v12 }
  0xda   : > { %804 = vmatprep.mubr.bf16.mxu0 %v2652_v12 }
  0xe0   : > { %2375 = vmatmul.mubr.msk.bf16.gmra.mxu1 %vm632_vm1, %v2485_v8 }
  0xe1   : > { %2342 = vmatmul.mubr.msk.bf16.gmra.mxu0 %vm632_vm1, %v2485_v8  ;;  %1167 = vmatprep.mubr.bf16.mxu1 %v2652_v12 }
  0xe2   : > { %814 = vmatprep.mubr.bf16.mxu0 %v2652_v12 }
  0xe8   : > { %2376 = vmatmul.mubr.msk.bf16.gmra.mxu1 %vm632_vm1, %v2486_v9 }
  0xe9   : > { %2343 = vmatmul.mubr.msk.bf16.gmra.mxu0 %vm632_vm1, %v2486_v9  ;;  %1177 = vmatprep.mubr.bf16.mxu1 %v2652_v12 }
  0xea   : > { %824 = vmatprep.mubr.bf16.mxu0 %v2652_v12 }
  0xf0   : > { %2377 = vmatmul.mubr.msk.bf16.gmra.mxu1 %vm632_vm1, %v2487_v10 }
  0xf1   : > { %2344 = vmatmul.mubr.msk.bf16.gmra.mxu0 %vm632_vm1, %v2487_v10  ;;  %1187 = vmatprep.mubr.bf16.mxu1 %v2652_v12 }
  0xf2   : > { %834 = vmatprep.mubr.bf16.mxu0 %v2652_v12 }
  0xf8   : > { %2378 = vmatmul.mubr.msk.bf16.gmra.mxu1 %vm632_vm1, %v2488_v11 }
  0xf9   : > { %2345 = vmatmul.mubr.msk.bf16.gmra.mxu0 %vm632_vm1, %v2488_v11  ;;  %1197 = vmatprep.mubr.bf16.mxu1 %v2652_v12 }
  0xfa   : > { %844 = vmatprep.mubr.bf16.mxu0 %v2652_v12 }
 0x100   : > { %2379 = vmatmul.mubr.msk.bf16.gmra.mxu1 %vm632_vm1, %v2489_v13 }
 0x101   : > { %2346 = vmatmul.mubr.msk.bf16.gmra.mxu0 %vm632_vm1, %v2489_v13  ;;  %1207 = vmatprep.mubr.bf16.mxu1 %v2652_v12 }
 0x102   : > { %854 = vmatprep.mubr.bf16.mxu0 %v2652_v12 }
 0x108   : > { %2380 = vmatmul.mubr.msk.bf16.gmra.mxu1 %vm632_vm1, %v2490_v14 }
 0x109   : > { %2347 = vmatmul.mubr.msk.bf16.gmra.mxu0 %vm632_vm1, %v2490_v14  ;;  %1217 = vmatprep.mubr.bf16.mxu1 %v2652_v12 }
 0x10a   : > { %864 = vmatprep.mubr.bf16.mxu0 %v2652_v12 }
 0x110   : > { %2381 = vmatmul.mubr.msk.bf16.gmra.mxu1 %vm632_vm1, %v2491_v15 }
 0x111   : > { %2348 = vmatmul.mubr.msk.bf16.gmra.mxu0 %vm632_vm1, %v2491_v15  ;;  %1227 = vmatprep.mubr.bf16.mxu1 %v2652_v12 }
 0x112   : > { %874 = vmatprep.mubr.bf16.mxu0 %v2652_v12 }
 0x118   : > { %2382 = vmatmul.mubr.msk.bf16.gmra.mxu1 %vm632_vm1, %v2492_v16 }
 0x119   : > { %2349 = vmatmul.mubr.msk.bf16.gmra.mxu0 %vm632_vm1, %v2492_v16  ;;  %1237 = vmatprep.mubr.bf16.mxu1 %v2652_v12 }
 0x11a   : > { %884 = vmatprep.mubr.bf16.mxu0 %v2652_v12 }
 0x120   : > { %2383 = vmatmul.mubr.msk.bf16.gmra.mxu1 %vm632_vm1, %v2493_v17 }
 0x121   : > { %2350 = vmatmul.mubr.msk.bf16.gmra.mxu0 %vm632_vm1, %v2493_v17  ;;  %1247 = vmatprep.mubr.bf16.mxu1 %v2652_v12 }
 0x122   : > { %894 = vmatprep.mubr.bf16.mxu0 %v2652_v12 }
 0x128   : > { %2384 = vmatmul.mubr.msk.bf16.gmra.mxu1 %vm632_vm1, %v2494_v18 }
 0x129   : > { %2351 = vmatmul.mubr.msk.bf16.gmra.mxu0 %vm632_vm1, %v2494_v18  ;;  %1257 = vmatprep.mubr.bf16.mxu1 %v2652_v12 }
 0x12a   : > { %904 = vmatprep.mubr.bf16.mxu0 %v2652_v12 }
 0x130   : > { %2385 = vmatmul.mubr.msk.bf16.gmra.mxu1 %vm632_vm1, %v2495_v19 }
 0x131   : > { %2352 = vmatmul.mubr.msk.bf16.gmra.mxu0 %vm632_vm1, %v2495_v19  ;;  %1267 = vmatprep.mubr.bf16.mxu1 %v2652_v12 }
 0x132   : > { %914 = vmatprep.mubr.bf16.mxu0 %v2652_v12 }
 0x138   : > { %2386 = vmatmul.mubr.msk.bf16.gmra.mxu1 %vm632_vm1, %v2496_v20 }
 0x139   : > { %2353 = vmatmul.mubr.msk.bf16.gmra.mxu0 %vm632_vm1, %v2496_v20  ;;  %1277 = vmatprep.mubr.bf16.mxu1 %v2652_v12 }
 0x13a   : > { %924 = vmatprep.mubr.bf16.mxu0 %v2652_v12 }
 0x140   : > { %2387 = vmatmul.mubr.msk.bf16.gmra.mxu1 %vm632_vm1, %v2497_v21 }
 0x141   : > { %2354 = vmatmul.mubr.msk.bf16.gmra.mxu0 %vm632_vm1, %v2497_v21  ;;  %1287 = vmatprep.mubr.bf16.mxu1 %v2652_v12 }
 0x142   : > { %934 = vmatprep.mubr.bf16.mxu0 %v2652_v12 }
 0x148   : > { %2388 = vmatmul.mubr.msk.bf16.gmra.mxu1 %vm632_vm1, %v2498_v22 }
 0x149   : > { %2355 = vmatmul.mubr.msk.bf16.gmra.mxu0 %vm632_vm1, %v2498_v22  ;;  %1297 = vmatprep.mubr.bf16.mxu1 %v2652_v12 }
 0x14a   : > { %944 = vmatprep.mubr.bf16.mxu0 %v2652_v12 }
 0x150   : > { %2389 = vmatmul.mubr.msk.bf16.gmra.mxu1 %vm632_vm1, %v2499_v23 }
 0x151   : > { %2356 = vmatmul.mubr.msk.bf16.gmra.mxu0 %vm632_vm1, %v2499_v23  ;;  %1307 = vmatprep.mubr.bf16.mxu1 %v2652_v12 }
 0x152   : > { %954 = vmatprep.mubr.bf16.mxu0 %v2652_v12 }
 0x153   : > { %v433_v24 = vpop.xlane.xlu1 %432  ;;  %v420_v25 = vpop.xlane.xlu0 %419 }
 0x154   : > { %v434_v26 = vrot.slane %v433_v24, 4  ;;  %v421_v27 = vrot.slane %v420_v25, 4 }
 0x156   : > { %v435_v29 = vadd.f32 %v434_v26, %v433_v24  ;;  %v422_v30 = vadd.f32 %v421_v27, %v420_v25  ;;  %v2508_v24 = vld [vmem:[%s3630_s2 + $0xd0] sm:$0xff]  }
 0x157   : > { %v446_v31 = vpop.xlane.xlu0 %445  ;;  %v459_v32 = vpop.xlane.xlu1 %458 }
 0x158   : > { %v436_v33 = vrot.slane %v435_v29, 2  ;;  %v423_v34 = vrot.slane %v422_v30, 2  ;;  %2390 = vmatmul.mubr.msk.bf16.gmra.mxu1 %vm632_vm1, %v2500_v28  ;;  %v447_v35 = vrot.slane %v446_v31, 4  ;;  %v460_v36 = vrot.slane %v459_v32, 4 }
 0x159   : > { %2357 = vmatmul.mubr.msk.bf16.gmra.mxu0 %vm632_vm1, %v2500_v28  ;;  %1317 = vmatprep.mubr.bf16.mxu1 %v2652_v12 }
 0x15a   : > { %v424_v37 = vadd.f32 %v423_v34, %v422_v30  ;;  %v437_v38 = vadd.f32 %v436_v33, %v435_v29  ;;  %964 = vmatprep.mubr.bf16.mxu0 %v2652_v12  ;;  %v448_v39 = vadd.f32 %v447_v35, %v446_v31  ;;  %v461_v40 = vadd.f32 %v460_v36, %v459_v32 }
 0x15c   : > { %v425_v41 = vrot.slane %v424_v37, 1  ;;  %v438_v42 = vrot.slane %v437_v38, 1  ;;  %v449_v43 = vrot.slane %v448_v39, 2  ;;  %v462_v44 = vrot.slane %v461_v40, 2 }
 0x15e   : > { %v426_v46 = vadd.f32 %v425_v41, %v424_v37  ;;  %v439_v47 = vadd.f32 %v438_v42, %v437_v38  ;;  %v450_v48 = vadd.f32 %v449_v43, %v448_v39  ;;  %v463_v49 = vadd.f32 %v462_v44, %v461_v40 }
 0x160   : > { %2419 = vpush %v426_v46  ;;  %2391 = vmatmul.mubr.msk.bf16.gmra.mxu1 %vm632_vm1, %v2501_v45  ;;  %v451_v50 = vrot.slane %v450_v48, 1  ;;  %v464_v51 = vrot.slane %v463_v49, 1 }
 0x161   : > { %2421 = vpush %v439_v47  ;;  %2358 = vmatmul.mubr.msk.bf16.gmra.mxu0 %vm632_vm1, %v2501_v45  ;;  %1327 = vmatprep.mubr.bf16.mxu1 %v2652_v12  ;;  %v2509_v45 = vld [vmem:[%s3630_s2 + $0xd8] sm:$0xff]  }
 0x162   : > { %974 = vmatprep.mubr.bf16.mxu0 %v2652_v12  ;;  %v452_v52 = vadd.f32 %v451_v50, %v450_v48  ;;  %v465_v53 = vadd.f32 %v464_v51, %v463_v49 }
 0x164   : > { %2423 = vpush %v452_v52 }
 0x165   : > { %2425 = vpush %v465_v53 }
 0x168   : > { %2392 = vmatmul.mubr.msk.bf16.gmra.mxu1 %vm632_vm1, %v2502_v54 }
 0x169   : > { %2359 = vmatmul.mubr.msk.bf16.gmra.mxu0 %vm632_vm1, %v2502_v54  ;;  %1337 = vmatprep.mubr.bf16.mxu1 %v2652_v12 }
 0x16a   : > { %984 = vmatprep.mubr.bf16.mxu0 %v2652_v12 }
 0x170   : > { %2393 = vmatmul.mubr.msk.bf16.gmra.mxu1 %vm632_vm1, %v2503_v55 }
 0x171   : > { %2360 = vmatmul.mubr.msk.bf16.gmra.mxu0 %vm632_vm1, %v2503_v55  ;;  %1347 = vmatprep.mubr.bf16.mxu1 %v2652_v12 }
 0x172   : > { %994 = vmatprep.mubr.bf16.mxu0 %v2652_v12 }
 0x178   : > { %2394 = vmatmul.mubr.msk.bf16.gmra.mxu1 %vm632_vm1, %v2504_v56 }
 0x179   : > { %2361 = vmatmul.mubr.msk.bf16.gmra.mxu0 %vm632_vm1, %v2504_v56  ;;  %1357 = vmatprep.mubr.bf16.mxu1 %v2652_v12 }
 0x17a   : > { %1004 = vmatprep.mubr.bf16.mxu0 %v2652_v12 }
 0x180   : > { %2395 = vmatmul.mubr.msk.bf16.gmra.mxu1 %vm632_vm1, %v2505_v57 }
 0x181   : > { %2362 = vmatmul.mubr.msk.bf16.gmra.mxu0 %vm632_vm1, %v2505_v57  ;;  %1367 = vmatprep.mubr.bf16.mxu1 %v2652_v12 }
 0x182   : > { %1014 = vmatprep.mubr.bf16.mxu0 %v2652_v12 }
 0x188   : > { %v1129_v59 = vpop.f32.mrf.mxu1  ;;  %2396 = vmatmul.mubr.msk.bf16.gmra.mxu1 %vm632_vm1, %v2506_v58 }
 0x189   : > { %v776_v60 = vpop.f32.mrf.mxu0  ;;  %2363 = vmatmul.mubr.msk.bf16.gmra.mxu0 %vm632_vm1, %v2506_v58  ;;  %1377 = vmatprep.mubr.bf16.mxu1 %v2652_v12  ;;  %v1450_v63 = vmax.f32 %v1129_v59, 0.0 }
 0x18a   : > { %1024 = vmatprep.mubr.bf16.mxu0 %v2652_v12  ;;  %v1131_v61 = vpop.f32.mrf.mxu1  ;;  %v1448_v5 = vmax.f32 %v776_v60, 0.0  ;;  %v2510_v60 = vld [vmem:[%s3630_s2 + $0xe0] sm:$0xff]  }
 0x18b   : > { %v778_v62 = vpop.f32.mrf.mxu0  ;;  %v1451_v3 = vmax.f32 %v1131_v61, 0.0 }
 0x18c   : > { %v1133_v0 = vpop.f32.mrf.mxu1  ;;  %v1449_v11 = vmax.f32 %v778_v62, 0.0 }
 0x18d   : > { %v780_v1 = vpop.f32.mrf.mxu0  ;;  %v1454_v4 = vmax.f32 %v1133_v0, 0.0  ;;  %v2653_v0 = vmov 1966171168  }
 0x18e   : > { %v1452_v6 = vmax.f32 %v780_v1, 0.0  ;;  %v1135_v7 = vpop.f32.mrf.mxu1  ;;  %v1842_v1 = vunpack.c.l.s4 %v2653_v0 }
 0x18f   : > { %v782_v8 = vpop.f32.mrf.mxu0  ;;  %v2957_v9 = vpack.c.bf16 %v1454_v4, %v1450_v63  ;;  %v1455_v10 = vmax.f32 %v1135_v7, 0.0 }
 0x190   : > { %v2959_v13 = vpack.c.bf16 %v1452_v6, %v1448_v5  ;;  %v1453_v14 = vmax.f32 %v782_v8, 0.0  ;;  %v1139_v15 = vpop.f32.mrf.mxu1  ;;  %2397 = vmatmul.mubr.msk.bf16.gmra.mxu1 %vm632_vm1, %v2507_v2  ;;  %v1843_v7 = vunpack.c.0.s8 %v1842_v1 }
 0x191   : > { %3647 = vst [vmem:[#allocation9_spill] sm:$0xff] %v2957_v9  ;;  %v786_v16 = vpop.f32.mrf.mxu0  ;;  %2364 = vmatmul.mubr.msk.bf16.gmra.mxu0 %vm632_vm1, %v2507_v2  ;;  %v2963_v17 = vpack.c.bf16 %v1455_v10, %v1451_v3  ;;  %1387 = vmatprep.mubr.bf16.mxu1 %v2652_v12  ;;  %v1458_v21 = vmax.f32 %v1139_v15, 0.0  ;;  %v1844_v2 = vlaneseq }
 0x192   : > { %v2966_v18 = vpack.c.bf16 %v1453_v14, %v1449_v11  ;;  %1034 = vmatprep.mubr.bf16.mxu0 %v2652_v12  ;;  %v1141_v19 = vpop.f32.mrf.mxu1  ;;  %v1456_v27 = vmax.f32 %v786_v16, 0.0 }
 0x193   : > { %3648 = vst [vmem:[#allocation10_spill] sm:$0xff] %v2963_v17  ;;  %v788_v20 = vpop.f32.mrf.mxu0  ;;  %v1459_v25 = vmax.f32 %v1141_v19, 0.0  ;;  %v3017_v8 = vshrl.u32 %v1844_v2, 7 }
 0x194   : > { %v1143_v22 = vpop.f32.mrf.mxu1  ;;  %v1457_v33 = vmax.f32 %v788_v20, 0.0 }
 0x195   : > { %v790_v23 = vpop.f32.mrf.mxu0  ;;  %v1462_v26 = vmax.f32 %v1143_v22, 0.0  ;;  %3654 = vst [vmem:[#allocation16_spill] sm:$0xff] %v3017_v8  ;;  %v1846_v15 = vsub.s32 %v1843_v7, %v3017_v8 }
 0x196   : > { %v1460_v28 = vmax.f32 %v790_v23, 0.0  ;;  %v1145_v29 = vpop.f32.mrf.mxu1  ;;  %v2511_v23 = vld [vmem:[%s3630_s2 + $0xe8] sm:$0xff]  }
 0x197   : > { %v792_v30 = vpop.f32.mrf.mxu0  ;;  %v2972_v31 = vpack.c.bf16 %v1462_v26, %v1458_v21  ;;  %v1463_v32 = vmax.f32 %v1145_v29, 0.0  ;;  %v2404_v21 = vld.sshfl [vmem:[%s3631_s3] sm:$0x33 pattern:$0x75316420] }
 0x198   : > { %v2974_v34 = vpack.c.bf16 %v1460_v28, %v1456_v27  ;;  %v1461_v35 = vmax.f32 %v792_v30, 0.0  ;;  %v1149_v36 = vpop.f32.mrf.mxu1  ;;  %2398 = vmatmul.mubr.msk.bf16.gmra.mxu1 %vm632_vm1, %v2508_v24 }
 0x199   : > { %3649 = vst [vmem:[#allocation11_spill] sm:$0xff] %v2972_v31  ;;  %v2977_v37 = vpop.f32.mrf.mxu0  ;;  %2365 = vmatmul.mubr.msk.bf16.gmra.mxu0 %vm632_vm1, %v2508_v24  ;;  %v2980_v38 = vpack.c.bf16 %v1463_v32, %v1459_v25  ;;  %1397 = vmatprep.mubr.bf16.mxu1 %v2652_v12  ;;  %v1466_v42 = vmax.f32 %v1149_v36, 0.0  ;;  %v3039_v25 = vrot.slane %v2404_v21, %v1846_v15 }
 0x19a   : > { %v2983_v39 = vpack.c.bf16 %v1461_v35, %v1457_v33  ;;  %1044 = vmatprep.mubr.bf16.mxu0 %v2652_v12  ;;  %v1151_v40 = vpop.f32.mrf.mxu1 }
 0x19b   : > { %3650 = vst [vmem:[#allocation12_spill] sm:$0xff] %v2980_v38  ;;  %v2986_v41 = vpop.f32.mrf.mxu0  ;;  %v1467_v46 = vmax.f32 %v1151_v40, 0.0  ;;  %v2512_v40 = vld [vmem:[%s3630_s2 + $0xf0] sm:$0xff]  }
 0x19c   : > { %v1153_v43 = vpop.f32.mrf.mxu1 }
 0x19d   : > { %v2988_v44 = vpop.f32.mrf.mxu0  ;;  %v1470_v47 = vmax.f32 %v1153_v43, 0.0 }
 0x19e   : > { %v1155_v48 = vpop.f32.mrf.mxu1 }
 0x19f   : > { %v2993_v49 = vpop.f32.mrf.mxu0  ;;  %v2995_v50 = vpack.c.bf16 %v1470_v47, %v1466_v42  ;;  %v1471_v51 = vmax.f32 %v1155_v48, 0.0  ;;  %v1840_v48 = vcombine.high %v2404_v21, %v2404_v21 }
 0x1a0   : > { %v1159_v52 = vpop.f32.mrf.mxu1  ;;  %2399 = vmatmul.mubr.msk.bf16.gmra.mxu1 %vm632_vm1, %v2509_v45 }
 0x1a1   : > { %3651 = vst [vmem:[#allocation13_spill] sm:$0xff] %v2995_v50  ;;  %v2998_v53 = vpop.f32.mrf.mxu0  ;;  %2366 = vmatmul.mubr.msk.bf16.gmra.mxu0 %vm632_vm1, %v2509_v45  ;;  %v3001_v54 = vpack.c.bf16 %v1471_v51, %v1467_v46  ;;  %1407 = vmatprep.mubr.bf16.mxu1 %v2652_v12  ;;  %v1474_v57 = vmax.f32 %v1159_v52, 0.0 }
 0x1a2   : > { %1054 = vmatprep.mubr.bf16.mxu0 %v2652_v12  ;;  %v1161_v55 = vpop.f32.mrf.mxu1 }
 0x1a3   : > { %3652 = vst [vmem:[#allocation14_spill] sm:$0xff] %v3001_v54  ;;  %v3005_v56 = vpop.f32.mrf.mxu0  ;;  %v1475_v61 = vmax.f32 %v1161_v55, 0.0 }
 0x1a4   : > { %v1163_v58 = vpop.f32.mrf.mxu1 }
 0x1a5   : > { %v3007_v59 = vpop.f32.mrf.mxu0  ;;  %v1478_v62 = vmax.f32 %v1163_v58, 0.0 }
 0x1a6   : > { %v1165_v63 = vpop.f32.mrf.mxu1 }
 0x1a7   : > { %v3012_v3 = vpop.f32.mrf.mxu0  ;;  %v3014_v4 = vpack.c.bf16 %v1478_v62, %v1474_v57  ;;  %v1479_v5 = vmax.f32 %v1165_v63, 0.0  ;;  %v2513_v57 = vld [vmem:[%s3630_s2 + $0xf8] sm:$0xff]  }
 0x1a8   : > { %v1169_v6 = vpop.f32.mrf.mxu1  ;;  %2400 = vmatmul.mubr.msk.bf16.gmra.mxu1 %vm632_vm1, %v2510_v60 }
 0x1a9   : > { %3653 = vst [vmem:[#allocation15_spill] sm:$0xff] %v3014_v4  ;;  %v3019_v10 = vpop.f32.mrf.mxu0  ;;  %2367 = vmatmul.mubr.msk.bf16.gmra.mxu0 %vm632_vm1, %v2510_v60  ;;  %v3022_v11 = vpack.c.bf16 %v1479_v5, %v1475_v61  ;;  %1417 = vmatprep.mubr.bf16.mxu1 %v2652_v12  ;;  %v1482_v19 = vmax.f32 %v1169_v6, 0.0  ;;  %v3083_v60 = vrot.slane %v1840_v48, %v1846_v15 }
 0x1aa   : > { %1064 = vmatprep.mubr.bf16.mxu0 %v2652_v12  ;;  %v3026_v14 = vpop.f32.mrf.mxu1 }
 0x1ab   : > { %3655 = vst [vmem:[#allocation17_spill] sm:$0xff] %v3022_v11  ;;  %v3029_v16 = vpop.f32.mrf.mxu0 }
 0x1ac   : > { %v1173_v20 = vpop.f32.mrf.mxu1 }
 0x1ad   : > { %v3034_v22 = vpop.f32.mrf.mxu0  ;;  %v1486_v24 = vmax.f32 %v1173_v20, 0.0 }
 0x1ae   : > { %v3041_v26 = vpop.f32.mrf.mxu1 }
 0x1af   : > { %v3043_v27 = vpop.f32.mrf.mxu0  ;;  %v3045_v28 = vpack.c.bf16 %v1486_v24, %v1482_v19 }
 0x1b0   : > { %v3047_v29 = vpop.f32.mrf.mxu1  ;;  %2401 = vmatmul.mubr.msk.bf16.gmra.mxu1 %vm632_vm1, %v2511_v23 }
 0x1b1   : > { %v3050_v30 = vpop.f32.mrf.mxu0  ;;  %2368 = vmatmul.mubr.msk.bf16.gmra.mxu0 %vm632_vm1, %v2511_v23  ;;  %1427 = vmatprep.mubr.bf16.mxu1 %v2652_v12 }
 0x1b2   : > { %1074 = vmatprep.mubr.bf16.mxu0 %v2652_v12  ;;  %v3055_v32 = vpop.f32.mrf.mxu1 }
 0x1b3   : > { %v3057_v33 = vpop.f32.mrf.mxu0 }
 0x1b4   : > { %v3059_v35 = vpop.f32.mrf.mxu1 }
 0x1b5   : > { %v3061_v36 = vpop.f32.mrf.mxu0 }
 0x1b6   : > { %v3066_v42 = vpop.f32.mrf.mxu1 }
 0x1b7   : > { %v832_v43 = vpop.f32.mrf.mxu0 }
 0x1b8   : > { %v3068_v45 = vpop.f32.mrf.mxu1  ;;  %2402 = vmatmul.mubr.msk.bf16.gmra.mxu1 %vm632_vm1, %v2512_v40  ;;  %v1493_v38 = vmax.f32 %v832_v43, 0.0 }
 0x1b9   : > { %v836_v46 = vpop.f32.mrf.mxu0  ;;  %2369 = vmatmul.mubr.msk.bf16.gmra.mxu0 %vm632_vm1, %v2512_v40  ;;  %1437 = vmatprep.mubr.bf16.mxu1 %v2652_v12 }
 0x1ba   : > { %1084 = vmatprep.mubr.bf16.mxu0 %v2652_v12  ;;  %v3074_v47 = vpop.f32.mrf.mxu1  ;;  %v1496_v4 = vmax.f32 %v836_v46, 0.0 }
 0x1bb   : > { %v838_v51 = vpop.f32.mrf.mxu0 }
 0x1bc   : > { %v3076_v52 = vpop.f32.mrf.mxu1  ;;  %v1497_v40 = vmax.f32 %v838_v51, 0.0 }
 0x1bd   : > { %v840_v55 = vpop.f32.mrf.mxu0 }
 0x1be   : > { %v3081_v58 = vpop.f32.mrf.mxu1  ;;  %v1500_v8 = vmax.f32 %v840_v55, 0.0 }
 0x1bf   : > { %v842_v61 = vpop.f32.mrf.mxu0 }
 0x1c0   : > { %v3085_v62 = vpop.f32.mrf.mxu1  ;;  %2403 = vmatmul.mubr.msk.bf16.gmra.mxu1 %vm632_vm1, %v2513_v57  ;;  %v1501_v15 = vmax.f32 %v842_v61, 0.0 }
 0x1c1   : > { %v846_v12 = vpop.f32.mrf.mxu0  ;;  %2370 = vmatmul.mubr.msk.bf16.gmra.mxu0 %vm632_vm1, %v2513_v57 }
 0x1c2   : > { %v3089_v63 = vpop.f32.mrf.mxu1  ;;  %1893 = vmatprep.mubr.bf16.mxu0 %v3083_v60  ;;  %v1504_v23 = vmax.f32 %v846_v12, 0.0  ;;  %v1729_v50 = vpack.c.bf16 %v1501_v15, %v1497_v40  ;;  %v1489_v12 = vmax.f32 %v3057_v33, 0.0 }
 0x1c3   : > { %v848_v0 = vpop.f32.mrf.mxu0 }
 0x1c4   : > { %v3092_v1 = vpop.f32.mrf.mxu1  ;;  %v1505_v19 = vmax.f32 %v848_v0, 0.0  ;;  %v1725_v46 = vpack.c.bf16 %v1493_v38, %v1489_v12 }
 0x1c5   : > { %v850_v2 = vpop.f32.mrf.mxu0 }
 0x1c6   : > { %v3094_v5 = vpop.f32.mrf.mxu1  ;;  %v1508_v6 = vmax.f32 %v850_v2, 0.0 }
 0x1c7   : > { %v852_v7 = vpop.f32.mrf.mxu0 }
 0x1c8   : > { %v1509_v20 = vmax.f32 %v852_v7, 0.0  ;;  %v1209_v21 = vpop.f32.mrf.mxu1  ;;  %v1732_v9 = vpack.c.bf16 %v1508_v6, %v1504_v23  ;;  %v1485_v7 = vmax.f32 %v3043_v27, 0.0  ;;  %v1492_v6 = vmax.f32 %v3061_v36, 0.0 }
 0x1c9   : > { %v856_v24 = vpop.f32.mrf.mxu0  ;;  %v1514_v31 = vmax.f32 %v1209_v21, 0.0  ;;  %v1488_v27 = vmax.f32 %v3050_v30, 0.0  ;;  %v1480_v30 = vmax.f32 %v3019_v10, 0.0 }
 0x1ca   : > { %v1733_v48 = vpack.c.bf16 %v1509_v20, %v1505_v19  ;;  %v1211_v57 = vpop.f32.mrf.mxu1  ;;  %v1512_v51 = vmax.f32 %v856_v24, 0.0  ;;  %v1728_v20 = vpack.c.bf16 %v1500_v8, %v1496_v4  ;;  %v1484_v4 = vmax.f32 %v3034_v22, 0.0 }
 0x1cb   : > { %v858_v17 = vpop.f32.mrf.mxu0  ;;  %v1515_v61 = vmax.f32 %v1211_v57, 0.0  ;;  %v1724_v38 = vpack.c.bf16 %v1492_v6, %v1488_v27  ;;  %v1476_v6 = vmax.f32 %v3007_v59, 0.0  ;;  %v1465_v59 = vmax.f32 %v2986_v41, 0.0 }
 0x1cc   : > { %1861 = vmatprep.subr.bf16.mxu0 %v1733_v48  ;;  %v1213_v54 = vpop.f32.mrf.mxu1  ;;  %v1513_v23 = vmax.f32 %v858_v17, 0.0  ;;  %v1477_v48 = vmax.f32 %v3012_v3, 0.0 }
 0x1cd   : > { %v860_v2 = vpop.f32.mrf.mxu0  ;;  %1862 = vmatpush1.bf16.msra.mxu0 %v1732_v9  ;;  %v1518_v0 = vmax.f32 %v1213_v54, 0.0 }
 0x1ce   : > { %v1516_v19 = vmax.f32 %v860_v2, 0.0  ;;  %1863 = vmatprep.subr.bf16.mxu0 %v1729_v50  ;;  %v1215_v55 = vpop.f32.mrf.mxu1  ;;  %v1481_v50 = vmax.f32 %v3029_v16, 0.0  ;;  %v1469_v16 = vmax.f32 %v2993_v49, 0.0  ;;  %v1472_v49 = vmax.f32 %v2998_v53, 0.0 }
 0x1cf   : > { %v862_v43 = vpop.f32.mrf.mxu0  ;;  %v3099_v15 = vpack.c.bf16 %v1518_v0, %v1514_v31  ;;  %v1519_v21 = vmax.f32 %v1215_v55, 0.0 }
 0x1d0   : > { %v3101_v9 = vpack.c.bf16 %v1516_v19, %v1512_v51  ;;  %v1517_v54 = vmax.f32 %v862_v43, 0.0  ;;  %v1219_v40 = vpop.f32.mrf.mxu1  ;;  %v1721_v57 = vpack.c.bf16 %v1485_v7, %v1481_v50  ;;  %v1473_v51 = vmax.f32 %v3005_v56, 0.0 }
 0x1d1   : > { %3656 = vst [vmem:[#allocation18_spill] sm:$0xff] %v3099_v15  ;;  %v866_v33 = vpop.f32.mrf.mxu0  ;;  %1864 = vmatpush1.bf16.msra.mxu0 %v1728_v20  ;;  %v3104_v24 = vpack.c.bf16 %v1519_v21, %v1515_v61  ;;  %v1522_v8 = vmax.f32 %v1219_v40, 0.0  ;;  %v1720_v20 = vpack.c.bf16 %v1484_v4, %v1480_v30  ;;  %v1468_v50 = vmax.f32 %v2988_v44, 0.0 }
 0x1d2   : > { %v3107_v36 = vpack.c.bf16 %v1517_v54, %v1513_v23  ;;  %1865 = vmatprep.subr.bf16.mxu0 %v1725_v46  ;;  %v1221_v31 = vpop.f32.mrf.mxu1  ;;  %v1520_v19 = vmax.f32 %v866_v33, 0.0  ;;  %v1717_v10 = vpack.c.bf16 %v1477_v48, %v1473_v51 }
 0x1d3   : > { %3657 = vst [vmem:[#allocation19_spill] sm:$0xff] %v3104_v24  ;;  %v868_v17 = vpop.f32.mrf.mxu0  ;;  %v1523_v61 = vmax.f32 %v1221_v31, 0.0  ;;  %v1716_v31 = vpack.c.bf16 %v1476_v6, %v1472_v49 }
 0x1d4   : > { %v1223_v2 = vpop.f32.mrf.mxu1  ;;  %v1521_v21 = vmax.f32 %v868_v17, 0.0  ;;  %v1713_v17 = vpack.c.bf16 %v1469_v16, %v1465_v59 }
 0x1d5   : > { %v870_v0 = vpop.f32.mrf.mxu0  ;;  %1866 = vmatpush1.bf16.msra.mxu0 %v1724_v38  ;;  %v1526_v12 = vmax.f32 %v1223_v2, 0.0 }
 0x1d6   : > { %v1524_v55 = vmax.f32 %v870_v0, 0.0  ;;  %1867 = vmatprep.subr.bf16.mxu0 %v1721_v57  ;;  %v1225_v22 = vpop.f32.mrf.mxu1 }
 0x1d7   : > { %v872_v3 = vpop.f32.mrf.mxu0  ;;  %v3115_v7 = vpack.c.bf16 %v1526_v12, %v1522_v8  ;;  %v1527_v43 = vmax.f32 %v1225_v22, 0.0  ;;  %v1464_v8 = vmax.f32 %v2977_v37, 0.0 }
 0x1d8   : > { %v3117_v46 = vpack.c.bf16 %v1524_v55, %v1520_v19  ;;  %v1525_v23 = vmax.f32 %v872_v3, 0.0  ;;  %v1229_v54 = vpop.f32.mrf.mxu1 }
 0x1d9   : > { %3658 = vst [vmem:[#allocation20_spill] sm:$0xff] %v3115_v7  ;;  %v3120_v56 = vpop.f32.mrf.mxu0  ;;  %1868 = vmatpush1.bf16.msra.mxu0 %v1720_v20  ;;  %v3122_v40 = vpack.c.bf16 %v1527_v43, %v1523_v61  ;;  %v1530_v38 = vmax.f32 %v1229_v54, 0.0  ;;  %v1712_v2 = vpack.c.bf16 %v1468_v50, %v1464_v8 }
 0x1da   : > { %v3125_v27 = vpack.c.bf16 %v1525_v23, %v1521_v21  ;;  %1869 = vmatprep.subr.bf16.mxu0 %v1717_v10  ;;  %v3127_v33 = vpop.f32.mrf.mxu1 }
 0x1db   : > { %3659 = vst [vmem:[#allocation21_spill] sm:$0xff] %v3122_v40  ;;  %3660 = vst [vmem:[#allocation22_spill] sm:$0xff] %v3127_v33  ;;  %v3130_v4 = vpop.f32.mrf.mxu0 }
 0x1dc   : > { %v1233_v53 = vpop.f32.mrf.mxu1 }
 0x1dd   : > { %v3133_v48 = vpop.f32.mrf.mxu0  ;;  %1870 = vmatpush1.bf16.msra.mxu0 %v1716_v31  ;;  %v1534_v57 = vmax.f32 %v1233_v53, 0.0 }
 0x1de   : > { %1871 = vmatprep.subr.bf16.mxu0 %v1713_v17  ;;  %v3135_v41 = vpop.f32.mrf.mxu1 }
 0x1df   : > { %3661 = vst [vmem:[#allocation23_spill] sm:$0xff] %v3135_v41  ;;  %v3137_v30 = vpop.f32.mrf.mxu0  ;;  %v3139_v0 = vpack.c.bf16 %v1534_v57, %v1530_v38 }
 0x1e0   : > { %v3141_v44 = vpop.f32.mrf.mxu1 }
 0x1e1   : > { %3662 = vst [vmem:[#allocation24_spill] sm:$0xff] %v3139_v0  ;;  %3663 = vst [vmem:[#allocation25_spill] sm:$0xff] %v3141_v44  ;;  %v3143_v61 = vpop.f32.mrf.mxu0  ;;  %1872 = vmatpush1.bf16.msra.mxu0 %v1712_v2 }
 0x1e2   : > { %1873 = vmatprep.subr.bf16.mxu0 %v2983_v39  ;;  %v3146_v37 = vpop.f32.mrf.mxu1 }
 0x1e3   : > { %3664 = vst [vmem:[#allocation26_spill] sm:$0xff] %v3146_v37  ;;  %v3148_v12 = vpop.f32.mrf.mxu0 }
 0x1e4   : > { %v3150_v16 = vpop.f32.mrf.mxu1 }
 0x1e5   : > { %3665 = vst [vmem:[#allocation27_spill] sm:$0xff] %v3150_v16  ;;  %v3152_v51 = vpop.f32.mrf.mxu0  ;;  %1874 = vmatpush1.bf16.msra.mxu0 %v2974_v34 }
 0x1e6   : > { %1875 = vmatprep.subr.bf16.mxu0 %v2966_v18  ;;  %v3156_v19 = vpop.f32.mrf.mxu1 }
 0x1e7   : > { %3666 = vst [vmem:[#allocation28_spill] sm:$0xff] %v3156_v19  ;;  %v3158_v55 = vpop.f32.mrf.mxu0 }
 0x1e8   : > { %v3160_v22 = vpop.f32.mrf.mxu1 }
 0x1e9   : > { %3667 = vst [vmem:[#allocation29_spill] sm:$0xff] %v3160_v22  ;;  %v3162_v6 = vpop.f32.mrf.mxu0  ;;  %1876 = vmatpush1.bf16.msra.mxu0 %v2959_v13 }
 0x1ea   : > { %v3165_v39 = vpop.f32.mrf.mxu1 }
 0x1eb   : > { %3668 = vst [vmem:[#allocation30_spill] sm:$0xff] %v3165_v39  ;;  %v3167_v20 = vpop.f32.mrf.mxu0 }
 0x1ec   : > { %v3169_v3 = vpop.f32.mrf.mxu1 }
 0x1ed   : > { %3669 = vst [vmem:[#allocation31_spill] sm:$0xff] %v3169_v3  ;;  %v3171_v43 = vpop.f32.mrf.mxu0 }
 0x1ee   : > { %v3173_v34 = vpop.f32.mrf.mxu1 }
 0x1ef   : > { %3670 = vst [vmem:[#allocation32_spill] sm:$0xff] %v3173_v34  ;;  %v3175_v18 = vpop.f32.mrf.mxu0 }
 0x1f0   : > { %v3177_v10 = vpop.f32.mrf.mxu1 }
 0x1f1   : > { %3671 = vst [vmem:[#allocation33_spill] sm:$0xff] %v3177_v10  ;;  %v3179_v21 = vpop.f32.mrf.mxu0 }
 0x1f2   : > { %v3181_v23 = vpop.f32.mrf.mxu1 }
 0x1f3   : > { %3672 = vst [vmem:[#allocation34_spill] sm:$0xff] %v3181_v23  ;;  %v908_v54 = vpop.f32.mrf.mxu0 }
 0x1f4   : > { %v3183_v13 = vpop.f32.mrf.mxu1 }
 0x1f5   : > { %3673 = vst [vmem:[#allocation35_spill] sm:$0xff] %v3183_v13  ;;  %v3185_v49 = vpop.f32.mrf.mxu0 }
 0x1f6   : > { %v3187_v59 = vpop.f32.mrf.mxu1 }
 0x1f7   : > { %3674 = vst [vmem:[#allocation36_spill] sm:$0xff] %v3187_v59  ;;  %v912_v50 = vpop.f32.mrf.mxu0 }
 0x1f8   : > { %v3189_v31 = vpop.f32.mrf.mxu1  ;;  %v1557_v33 = vmax.f32 %v912_v50, 0.0 }
 0x1f9   : > { %3675 = vst [vmem:[#allocation37_spill] sm:$0xff] %v3189_v31  ;;  %v916_v38 = vpop.f32.mrf.mxu0 }
 0x1fa   : > { %v3191_v17 = vpop.f32.mrf.mxu1 }
 0x1fb   : > { %3676 = vst [vmem:[#allocation38_spill] sm:$0xff] %v3191_v17  ;;  %v918_v53 = vpop.f32.mrf.mxu0 }
 0x1fc   : > { %v3193_v8 = vpop.f32.mrf.mxu1  ;;  %v1561_v59 = vmax.f32 %v918_v53, 0.0 }
 0x1fd   : > { %3677 = vst [vmem:[#allocation39_spill] sm:$0xff] %v3193_v8  ;;  %v920_v57 = vpop.f32.mrf.mxu0 }
 0x1fe   : > { %v3195_v2 = vpop.f32.mrf.mxu1  ;;  %v1564_v39 = vmax.f32 %v920_v57, 0.0 }
 0x1ff   : > { %3678 = vst [vmem:[#allocation40_spill] sm:$0xff] %v3195_v2  ;;  %v922_v15 = vpop.f32.mrf.mxu0 }
 0x200   : > { %v3197_v24 = vpop.f32.mrf.mxu1  ;;  %v1565_v10 = vmax.f32 %v922_v15, 0.0 }
 0x201   : > { %3679 = vst [vmem:[#allocation41_spill] sm:$0xff] %v3197_v24  ;;  %v926_v7 = vpop.f32.mrf.mxu0 }
 0x202   : > { %v3199_v40 = vpop.f32.mrf.mxu1  ;;  %v1568_v17 = vmax.f32 %v926_v7, 0.0  ;;  %v1553_v7 = vmax.f32 %v908_v54, 0.0 }
 0x203   : > { %3680 = vst [vmem:[#allocation42_spill] sm:$0xff] %v3199_v40  ;;  %v928_v0 = vpop.f32.mrf.mxu0 }
 0x204   : > { %v3201_v16 = vpop.f32.mrf.mxu1  ;;  %v1569_v31 = vmax.f32 %v928_v0, 0.0 }
 0x205   : > { %3681 = vst [vmem:[#allocation43_spill] sm:$0xff] %v3201_v16  ;;  %v930_v44 = vpop.f32.mrf.mxu0  ;;  %v1761_v16 = vpack.c.bf16 %v1565_v10, %v1561_v59 }
 0x206   : > { %v3203_v3 = vpop.f32.mrf.mxu1  ;;  %v1572_v22 = vmax.f32 %v930_v44, 0.0 }
 0x207   : > { %3682 = vst [vmem:[#allocation44_spill] sm:$0xff] %v3203_v3  ;;  %v932_v13 = vpop.f32.mrf.mxu0  ;;  %v1560_v3 = vmax.f32 %v916_v38, 0.0 }
 0x208   : > { %v1573_v8 = vmax.f32 %v932_v13, 0.0  ;;  %v1289_v34 = vpop.f32.mrf.mxu1  ;;  %v1764_v19 = vpack.c.bf16 %v1572_v22, %v1568_v17  ;;  %v1549_v13 = vmax.f32 %v3175_v18, 0.0  ;;  %v1556_v22 = vmax.f32 %v3185_v49, 0.0 }
 0x209   : > { %v936_v2 = vpop.f32.mrf.mxu0  ;;  %v1578_v41 = vmax.f32 %v1289_v34, 0.0  ;;  %v1760_v17 = vpack.c.bf16 %v1564_v39, %v1560_v3  ;;  %v1548_v39 = vmax.f32 %v3171_v43, 0.0  ;;  %v1541_v3 = vmax.f32 %v3158_v55, 0.0 }
 0x20a   : > { %v1765_v23 = vpack.c.bf16 %v1573_v8, %v1569_v31  ;;  %v1291_v24 = vpop.f32.mrf.mxu1  ;;  %v1576_v11 = vmax.f32 %v936_v2, 0.0 }
 0x20b   : > { %v938_v37 = vpop.f32.mrf.mxu0  ;;  %v1579_v15 = vmax.f32 %v1291_v24, 0.0 }
 0x20c   : > { %1877 = vmatprep.subr.bf16.mxu0 %v1765_v23  ;;  %v1293_v40 = vpop.f32.mrf.mxu1  ;;  %v1757_v23 = vpack.c.bf16 %v1557_v33, %v1553_v7  ;;  %v1577_v59 = vmax.f32 %v938_v37, 0.0 }
 0x20d   : > { %v940_v44 = vpop.f32.mrf.mxu0  ;;  %1878 = vmatpush2.bf16.msra.mxu0 %v1764_v19  ;;  %v1582_v0 = vmax.f32 %v1293_v40, 0.0  ;;  %v1552_v19 = vmax.f32 %v3179_v21, 0.0  ;;  %v1544_v21 = vmax.f32 %v3162_v6, 0.0 }
 0x20e   : > { %v1580_v53 = vmax.f32 %v940_v44, 0.0  ;;  %1879 = vmatprep.subr.bf16.mxu0 %v1761_v16  ;;  %v1295_v31 = vpop.f32.mrf.mxu1  ;;  %v1545_v16 = vmax.f32 %v3167_v20, 0.0  ;;  %v1533_v20 = vmax.f32 %v3137_v30, 0.0  ;;  %v1536_v30 = vmax.f32 %v3143_v61, 0.0 }
 0x20f   : > { %v942_v34 = vpop.f32.mrf.mxu0  ;;  %v3207_v50 = vpack.c.bf16 %v1582_v0, %v1578_v41  ;;  %v1583_v10 = vmax.f32 %v1295_v31, 0.0  ;;  %v1756_v33 = vpack.c.bf16 %v1556_v22, %v1552_v19  ;;  %v1537_v0 = vmax.f32 %v3148_v12, 0.0 }
 0x210   : > { %v3209_v38 = vpack.c.bf16 %v1580_v53, %v1576_v11  ;;  %v1581_v24 = vmax.f32 %v942_v34, 0.0  ;;  %v1299_v40 = vpop.f32.mrf.mxu1  ;;  %v1753_v8 = vpack.c.bf16 %v1549_v13, %v1545_v16  ;;  %v1540_v31 = vmax.f32 %v3152_v51, 0.0 }
 0x211   : > { %3683 = vst [vmem:[#allocation45_spill] sm:$0xff] %v3207_v50  ;;  %v946_v18 = vpop.f32.mrf.mxu0  ;;  %1880 = vmatpush2.bf16.msra.mxu0 %v1760_v17  ;;  %v3212_v54 = vpack.c.bf16 %v1583_v10, %v1579_v15  ;;  %v1586_v11 = vmax.f32 %v1299_v40, 0.0  ;;  %v1752_v22 = vpack.c.bf16 %v1548_v39, %v1544_v21  ;;  %v1749_v6 = vpack.c.bf16 %v1541_v3, %v1537_v0 }
 0x212   : > { %v3215_v49 = vpack.c.bf16 %v1581_v24, %v1577_v59  ;;  %1881 = vmatprep.subr.bf16.mxu0 %v1757_v23  ;;  %v1301_v41 = vpop.f32.mrf.mxu1  ;;  %v1584_v7 = vmax.f32 %v946_v18, 0.0  ;;  %v1529_v51 = vmax.f32 %v3130_v4, 0.0  ;;  %v1532_v18 = vmax.f32 %v3133_v48, 0.0 }
 0x213   : > { %3684 = vst [vmem:[#allocation46_spill] sm:$0xff] %v3212_v54  ;;  %v948_v37 = vpop.f32.mrf.mxu0  ;;  %v1587_v44 = vmax.f32 %v1301_v41, 0.0  ;;  %v1748_v16 = vpack.c.bf16 %v1540_v31, %v1536_v30  ;;  %v1528_v61 = vmax.f32 %v3120_v56, 0.0  ;;  %v1503_v30 = vmax.f32 %v3081_v58, 0.0  ;;  %v3717_v54 = vld [vmem:[#allocation34_spill] sm:$0xff] }
 0x214   : > { %v1303_v57 = vpop.f32.mrf.mxu1  ;;  %v1585_v34 = vmax.f32 %v948_v37, 0.0 }
 0x215   : > { %v950_v2 = vpop.f32.mrf.mxu0  ;;  %1882 = vmatpush2.bf16.msra.mxu0 %v1756_v33  ;;  %v1590_v15 = vmax.f32 %v1303_v57, 0.0  ;;  %v1745_v33 = vpack.c.bf16 %v1533_v20, %v1529_v51  ;;  %v1744_v57 = vpack.c.bf16 %v1532_v18, %v1528_v61  ;;  %v1498_v18 = vmax.f32 %v3068_v45, 0.0 }
 0x216   : > { %v1588_v53 = vmax.f32 %v950_v2, 0.0  ;;  %1883 = vmatprep.subr.bf16.mxu0 %v1753_v8  ;;  %v1305_v43 = vpop.f32.mrf.mxu1 }
 0x217   : > { %v952_v55 = vpop.f32.mrf.mxu0  ;;  %v3223_v13 = vpack.c.bf16 %v1590_v15, %v1586_v11  ;;  %v1591_v17 = vmax.f32 %v1305_v43, 0.0  ;;  %v1511_v43 = vmax.f32 %v3094_v5, 0.0  ;;  %v1499_v5 = vmax.f32 %v3074_v47, 0.0 }
 0x218   : > { %v3225_v10 = vpack.c.bf16 %v1588_v53, %v1584_v7  ;;  %v1589_v23 = vmax.f32 %v952_v55, 0.0  ;;  %v1309_v59 = vpop.f32.mrf.mxu1  ;;  %v1507_v53 = vmax.f32 %v3089_v63, 0.0  ;;  %v1502_v47 = vmax.f32 %v3076_v52, 0.0 }
 0x219   : > { %3685 = vst [vmem:[#allocation47_spill] sm:$0xff] %v3223_v13  ;;  %v3228_v12 = vpop.f32.mrf.mxu0  ;;  %1884 = vmatpush2.bf16.msra.mxu0 %v1752_v22  ;;  %v3230_v24 = vpack.c.bf16 %v1591_v17, %v1587_v44  ;;  %v1594_v39 = vmax.f32 %v1309_v59, 0.0  ;;  %v1490_v52 = vmax.f32 %v3047_v29, 0.0  ;;  %v1555_v13 = vmax.f32 %v3717_v54, 0.0 }
 0x21a   : > { %v3233_v40 = vpack.c.bf16 %v1589_v23, %v1585_v34  ;;  %1885 = vmatprep.subr.bf16.mxu0 %v1749_v6  ;;  %v1311_v19 = vpop.f32.mrf.mxu1  ;;  %v1510_v34 = vmax.f32 %v3092_v1, 0.0  ;;  %v1735_v51 = vpack.c.bf16 %v1511_v43, %v1507_v53 }
 0x21b   : > { %3686 = vst [vmem:[#allocation48_spill] sm:$0xff] %v3230_v24  ;;  %v3236_v41 = vpop.f32.mrf.mxu0  ;;  %v1595_v3 = vmax.f32 %v1311_v19, 0.0 }
 0x21c   : > { %v1313_v37 = vpop.f32.mrf.mxu1 }
 0x21d   : > { %v3239_v11 = vpop.f32.mrf.mxu0  ;;  %1886 = vmatpush2.bf16.msra.mxu0 %v1748_v16  ;;  %v1598_v8 = vmax.f32 %v1313_v37, 0.0  ;;  %v1731_v37 = vpack.c.bf16 %v1503_v30, %v1499_v5  ;;  %v3699_v5 = vld [vmem:[#allocation17_spill] sm:$0xff] }
 0x21e   : > { %1887 = vmatprep.subr.bf16.mxu0 %v1745_v33  ;;  %v1315_v4 = vpop.f32.mrf.mxu1  ;;  %v1495_v33 = vmax.f32 %v3066_v42, 0.0 }
 0x21f   : > { %v3241_v21 = vpop.f32.mrf.mxu0  ;;  %v3243_v2 = vpack.c.bf16 %v1598_v8, %v1594_v39  ;;  %v1599_v48 = vmax.f32 %v1315_v4, 0.0 }
 0x220   : > { %v1319_v44 = vpop.f32.mrf.mxu1 }
 0x221   : > { %3687 = vst [vmem:[#allocation49_spill] sm:$0xff] %v3243_v2  ;;  %v3245_v15 = vpop.f32.mrf.mxu0  ;;  %1888 = vmatpush2.bf16.msra.mxu0 %v1744_v57  ;;  %v3247_v20 = vpack.c.bf16 %v1599_v48, %v1595_v3  ;;  %v1602_v7 = vmax.f32 %v1319_v44, 0.0  ;;  %v1494_v57 = vmax.f32 %v3059_v35, 0.0 }
 0x222   : > { %1889 = vmatprep.subr.bf16.mxu0 %v3125_v27  ;;  %v1321_v56 = vpop.f32.mrf.mxu1  ;;  %v1506_v27 = vmax.f32 %v3085_v62, 0.0  ;;  %v3273_v62 = vcombine.high %v3083_v60, %v3083_v60 }
 0x223   : > { %3688 = vst [vmem:[#allocation50_spill] sm:$0xff] %v3247_v20  ;;  %v3250_v0 = vpop.f32.mrf.mxu0  ;;  %v1603_v55 = vmax.f32 %v1321_v56, 0.0  ;;  %v1483_v56 = vmax.f32 %v3026_v14, 0.0  ;;  %v3720_v20 = vld [vmem:[#allocation10_spill] sm:$0xff] }
 0x224   : > { %v1323_v31 = vpop.f32.mrf.mxu1  ;;  %3691 = vst [vmem:[#allocation53_spill] sm:$0xff] %v3273_v62  ;;  %v1734_v16 = vpack.c.bf16 %v1510_v34, %v1506_v27  ;;  %1934 = vmatprep.mubr.bf16.mxu1 %v3273_v62 }
 0x225   : > { %v3254_v22 = vpop.f32.mrf.mxu0  ;;  %1890 = vmatpush2.bf16.msra.mxu0 %v3117_v46  ;;  %v1606_v17 = vmax.f32 %v1323_v31, 0.0  ;;  %v1726_v31 = vpack.c.bf16 %v1494_v57, %v1490_v52 }
 0x226   : > { %1891 = vmatprep.subr.bf16.mxu0 %v3107_v36  ;;  %v1325_v6 = vpop.f32.mrf.mxu1 }
 0x227   : > { %v3260_v23 = vpop.f32.mrf.mxu0  ;;  %v3262_v59 = vpack.c.bf16 %v1606_v17, %v1602_v7  ;;  %v1607_v63 = vmax.f32 %v1325_v6, 0.0  ;;  %v1487_v7 = vmax.f32 %v3041_v26, 0.0 }
 0x228   : > { %v1329_v46 = vpop.f32.mrf.mxu1 }
 0x229   : > { %3689 = vst [vmem:[#allocation51_spill] sm:$0xff] %v3262_v59  ;;  %v3266_v19 = vpop.f32.mrf.mxu0  ;;  %1892 = vmatpush2.bf16.msra.mxu0 %v3101_v9  ;;  %v3269_v36 = vpack.c.bf16 %v1607_v63, %v1603_v55  ;;  %v1610_v39 = vmax.f32 %v1329_v46, 0.0  ;;  %v1491_v9 = vmax.f32 %v3055_v32, 0.0  ;;  %v1730_v32 = vpack.c.bf16 %v1502_v47, %v1498_v18  ;;  %v3702_v18 = vld [vmem:[#allocation15_spill] sm:$0xff]  ;;  %v3703_v47 = vld [vmem:[#allocation14_spill] sm:$0xff] }
 0x22a   : > { %1943 = vmatprep.subr.bf16.mxu0 %v1735_v51  ;;  %v1331_v1 = vpop.f32.mrf.mxu1  ;;  %v1723_v17 = vpack.c.bf16 %v1487_v7, %v1483_v56  ;;  %v3712_v7 = vld [vmem:[#allocation23_spill] sm:$0xff] }
 0x22b   : > { %3690 = vst [vmem:[#allocation52_spill] sm:$0xff] %v3269_v36  ;;  %v3277_v58 = vpop.f32.mrf.mxu0  ;;  %v1611_v45 = vmax.f32 %v1331_v1, 0.0  ;;  %v1727_v53 = vpack.c.bf16 %v1495_v33, %v1491_v9 }
 0x22c   : > { %1894 = vmatmul.mubr.bf16.vlgmr.msra.gmra.mxu0 %v3039_v25  ;;  %v1333_v61 = vpop.f32.mrf.mxu1 }
 0x22d   : > { %v3283_v3 = vpop.f32.mrf.mxu0  ;;  %1944 = vmatpush1.bf16.msra.mxu0 %v1734_v16  ;;  %v1614_v8 = vmax.f32 %v1333_v61, 0.0  ;;  %1975 = vmatprep.mubr.bf16.mxu0 %v3083_v60 }
 0x22e   : > { %1945 = vmatprep.subr.bf16.mxu0 %v1731_v37  ;;  %v1335_v4 = vpop.f32.mrf.mxu1  ;;  %v3707_v37 = vld [vmem:[#allocation12_spill] sm:$0xff] }
 0x22f   : > { %v3288_v48 = vpop.f32.mrf.mxu0  ;;  %v3290_v42 = vpack.c.bf16 %v1614_v8, %v1610_v39  ;;  %v1615_v44 = vmax.f32 %v1335_v4, 0.0  ;;  %v3708_v8 = vld [vmem:[#allocation42_spill] sm:$0xff]  ;;  %v3709_v4 = vld [vmem:[#allocation44_spill] sm:$0xff] }
 0x230   : > { %v3294_v43 = vpop.f32.mrf.mxu1  ;;  %v1571_v52 = vmax.f32 %v3708_v8, 0.0  ;;  %v1575_v57 = vmax.f32 %v3709_v4, 0.0  ;;  %v3718_v8 = vld [vmem:[#allocation36_spill] sm:$0xff]  ;;  %v3719_v4 = vld [vmem:[#allocation38_spill] sm:$0xff] }
 0x231   : > { %3692 = vst [vmem:[#allocation54_spill] sm:$0xff] %v3290_v42  ;;  %3693 = vst [vmem:[#allocation55_spill] sm:$0xff] %v3294_v43  ;;  %v3296_v60 = vpop.f32.mrf.mxu0  ;;  %1946 = vmatpush1.bf16.msra.mxu0 %v1730_v32  ;;  %v3298_v29 = vpack.c.bf16 %v1615_v44, %v1611_v45  ;;  %v3711_v44 = vld [vmem:[#allocation22_spill] sm:$0xff]  ;;  %v1559_v24 = vmax.f32 %v3718_v8, 0.0  ;;  %v1563_v2 = vmax.f32 %v3719_v4, 0.0  ;;  %v3724_v42 = vld [vmem:[#allocation43_spill] sm:$0xff] }
 0x232   : > { %1947 = vmatprep.subr.bf16.mxu0 %v1727_v53  ;;  %v3300_v35 = vpop.f32.mrf.mxu1  ;;  %v3722_v53 = vld [vmem:[#allocation40_spill] sm:$0xff]  ;;  %v1767_v54 = vpack.c.bf16 %v1575_v57, %v1571_v52  ;;  %v3726_v4 = vld [vmem:[#allocation37_spill] sm:$0xff] }
 0x233   : > { %3694 = vst [vmem:[#allocation56_spill] sm:$0xff] %v3298_v29  ;;  %3695 = vst [vmem:[#allocation57_spill] sm:$0xff] %v3300_v35  ;;  %v3302_v55 = vpop.f32.mrf.mxu0  ;;  %v1567_v59 = vmax.f32 %v3722_v53, 0.0  ;;  %v1574_v29 = vmax.f32 %v3724_v42, 0.0  ;;  %v3725_v8 = vld [vmem:[#allocation32_spill] sm:$0xff]  ;;  %v1562_v35 = vmax.f32 %v3726_v4, 0.0 }
 0x234   : > { %v3304_v6 = vpop.f32.mrf.mxu1  ;;  %v3728_v53 = vld [vmem:[#allocation9_spill] sm:$0xff] }
 0x235   : > { %3696 = vst [vmem:[#allocation58_spill] sm:$0xff] %v3304_v6  ;;  %v3306_v14 = vpop.f32.mrf.mxu0  ;;  %1948 = vmatpush1.bf16.msra.mxu0 %v1726_v31  ;;  %v3713_v31 = vld [vmem:[#allocation26_spill] sm:$0xff] }
 0x236   : > { %1949 = vmatprep.subr.bf16.mxu0 %v1723_v17  ;;  %v3308_v26 = vpop.f32.mrf.mxu1  ;;  %v3723_v17 = vld [vmem:[#allocation41_spill] sm:$0xff] }
 0x237   : > { %3697 = vst [vmem:[#allocation59_spill] sm:$0xff] %v3308_v26  ;;  %v3310_v27 = vpop.f32.mrf.mxu0  ;;  %v1570_v36 = vmax.f32 %v3723_v17, 0.0  ;;  %v3729_v17 = vld [vmem:[#allocation33_spill] sm:$0xff] }
 0x238   : > { %v3312_v34 = vpop.f32.mrf.mxu1 }
 0x239   : > { %3698 = vst [vmem:[#allocation60_spill] sm:$0xff] %v3312_v34  ;;  %v3314_v63 = vpop.f32.mrf.mxu0  ;;  %1950 = vmatpush1.bf16.msra.mxu0 %v3045_v28  ;;  %v3706_v28 = vld [vmem:[#allocation13_spill] sm:$0xff] }
 0x23a   : > { %1951 = vmatprep.subr.bf16.mxu0 %v3699_v5  ;;  %v3318_v30 = vpop.f32.mrf.mxu1  ;;  %v3714_v5 = vld [vmem:[#allocation28_spill] sm:$0xff] }
 0x23b   : > { %3700 = vst [vmem:[#allocation17_spill] sm:$0xff] %v3318_v30  ;;  %v998_v51 = vpop.f32.mrf.mxu0  ;;  %v3730_v30 = vld [vmem:[#allocation35_spill] sm:$0xff] }
 0x23c   : > { %v3320_v46 = vpop.f32.mrf.mxu1  ;;  %v1558_v42 = vmax.f32 %v3730_v30, 0.0 }
 0x23d   : > { %3701 = vst [vmem:[#allocation61_spill] sm:$0xff] %v3320_v46  ;;  %v3322_v1 = vpop.f32.mrf.mxu0  ;;  %1952 = vmatpush1.bf16.msra.mxu0 %v3702_v18 }
 0x23e   : > { %1953 = vmatprep.subr.bf16.mxu0 %v3703_v47  ;;  %v3326_v16 = vpop.f32.mrf.mxu1  ;;  %v1628_v52 = vmax.f32 %v3322_v1, 0.0 }
 0x23f   : > { %3704 = vst [vmem:[#allocation15_spill] sm:$0xff] %v3326_v16  ;;  %v1002_v39 = vpop.f32.mrf.mxu0 }
 0x240   : > { %v3328_v9 = vpop.f32.mrf.mxu1  ;;  %v1629_v6 = vmax.f32 %v1002_v39, 0.0 }
 0x241   : > { %3705 = vst [vmem:[#allocation14_spill] sm:$0xff] %v3328_v9  ;;  %v1006_v33 = vpop.f32.mrf.mxu0  ;;  %1954 = vmatpush1.bf16.msra.mxu0 %v3706_v28  ;;  %v3715_v28 = vld [vmem:[#allocation11_spill] sm:$0xff] }
 0x242   : > { %1955 = vmatprep.subr.bf16.mxu0 %v3707_v37  ;;  %v3332_v61 = vpop.f32.mrf.mxu1  ;;  %v3716_v37 = vld [vmem:[#allocation30_spill] sm:$0xff]  ;;  %v1632_v34 = vmax.f32 %v1006_v33, 0.0  ;;  %v1759_v33 = vpack.c.bf16 %v1559_v24, %v1555_v13  ;;  %v1620_v24 = vmax.f32 %v3306_v14, 0.0 }
 0x243   : > { %v1008_v45 = vpop.f32.mrf.mxu0 }
 0x244   : > { %v3336_v32 = vpop.f32.mrf.mxu1  ;;  %v1633_v50 = vmax.f32 %v1008_v45, 0.0 }
 0x245   : > { %3710 = vst [vmem:[#allocation13_spill] sm:$0xff] %v3336_v32  ;;  %v1010_v47 = vpop.f32.mrf.mxu0  ;;  %1956 = vmatpush1.bf16.msra.mxu0 %v3715_v28  ;;  %v1625_v32 = vmax.f32 %v998_v51, 0.0 }
 0x246   : > { %1957 = vmatprep.subr.bf16.mxu0 %v3720_v20  ;;  %v3348_v56 = vpop.f32.mrf.mxu1  ;;  %v1636_v18 = vmax.f32 %v1010_v47, 0.0  ;;  %v3727_v20 = vld [vmem:[#allocation39_spill] sm:$0xff]  ;;  %v1554_v47 = vmax.f32 %v3729_v17, 0.0  ;;  %v1624_v17 = vmax.f32 %v3314_v63, 0.0 }
 0x247   : > { %3721 = vst [vmem:[#allocation12_spill] sm:$0xff] %v3348_v56  ;;  %v1012_v28 = vpop.f32.mrf.mxu0  ;;  %v1566_v46 = vmax.f32 %v3727_v20, 0.0  ;;  %v1621_v20 = vmax.f32 %v3310_v27, 0.0  ;;  %v1793_v9 = vpack.c.bf16 %v1629_v6, %v1625_v32  ;;  %v1763_v56 = vpack.c.bf16 %v1567_v59, %v1563_v2  ;;  %v3731_v32 = vld [vmem:[#allocation29_spill] sm:$0xff] }
 0x248   : > { %v1637_v43 = vmax.f32 %v1012_v28, 0.0  ;;  %v1369_v62 = vpop.f32.mrf.mxu1  ;;  %v1796_v57 = vpack.c.bf16 %v1636_v18, %v1632_v34  ;;  %v1766_v28 = vpack.c.bf16 %v1574_v29, %v1570_v36  ;;  %v1613_v34 = vmax.f32 %v3288_v48, 0.0 }
 0x249   : > { %v1016_v16 = vpop.f32.mrf.mxu0  ;;  %1958 = vmatpush1.bf16.msra.mxu0 %v3728_v53  ;;  %v1642_v4 = vmax.f32 %v1369_v62, 0.0  ;;  %v1762_v30 = vpack.c.bf16 %v1566_v46, %v1562_v35  ;;  %v1617_v36 = vmax.f32 %v3302_v55, 0.0  ;;  %v1792_v2 = vpack.c.bf16 %v1628_v52, %v1624_v17 }
 0x24a   : > { %v1797_v39 = vpack.c.bf16 %v1637_v43, %v1633_v50  ;;  %v1371_v45 = vpop.f32.mrf.mxu1  ;;  %1959 = vmatprep.subr.bf16.mxu0 %v1767_v54  ;;  %v1640_v62 = vmax.f32 %v1016_v16, 0.0  ;;  %v1546_v55 = vmax.f32 %v3731_v32, 0.0  ;;  %v3732_v16 = vld [vmem:[#allocation31_spill] sm:$0xff]  ;;  %v3733_v54 = vld [vmem:[#allocation25_spill] sm:$0xff] }
 0x24b   : > { %v1018_v26 = vpop.f32.mrf.mxu0  ;;  %v1643_v50 = vmax.f32 %v1371_v45, 0.0  ;;  %v1789_v27 = vpack.c.bf16 %v1621_v20, %v1617_v36  ;;  %v1550_v18 = vmax.f32 %v3732_v16, 0.0  ;;  %v3734_v45 = vld [vmem:[#allocation27_spill] sm:$0xff] }
 0x24c   : > { %1902 = vmatprep.subr.bf16.mxu1 %v1797_v39  ;;  %v1373_v53 = vpop.f32.mrf.mxu1  ;;  %v1641_v63 = vmax.f32 %v1018_v26, 0.0  ;;  %v1538_v39 = vmax.f32 %v3733_v54, 0.0  ;;  %v1542_v52 = vmax.f32 %v3734_v45, 0.0  ;;  %v1609_v26 = vmax.f32 %v3277_v58, 0.0 }
 0x24d   : > { %v1020_v51 = vpop.f32.mrf.mxu0  ;;  %1903 = vmatpush1.bf16.msra.mxu1 %v1796_v57  ;;  %v1646_v43 = vmax.f32 %v1373_v53, 0.0  ;;  %1960 = vmatpush2.bf16.msra.mxu0 %v1766_v28  ;;  %v3737_v58 = vmax.f32 %v3716_v37, 0.0 }
 0x24e   : > { %v1644_v29 = vmax.f32 %v1020_v51, 0.0  ;;  %1904 = vmatprep.subr.bf16.mxu1 %v1793_v9  ;;  %v1375_v13 = vpop.f32.mrf.mxu1  ;;  %1961 = vmatprep.subr.bf16.mxu0 %v1763_v56  ;;  %v1616_v9 = vmax.f32 %v3296_v60, 0.0  ;;  %v1758_v60 = vpack.c.bf16 %v1558_v42, %v1554_v47  ;;  %v1605_v51 = vmax.f32 %v3260_v23, 0.0 }
 0x24f   : > { %v1022_v59 = vpop.f32.mrf.mxu0  ;;  %v3365_v6 = vpack.c.bf16 %v1646_v43, %v1642_v4  ;;  %v1647_v35 = vmax.f32 %v1375_v13, 0.0  ;;  %v1612_v4 = vmax.f32 %v3283_v3, 0.0  ;;  %v1785_v36 = vpack.c.bf16 %v1613_v34, %v1609_v26 }
 0x250   : > { %v3367_v46 = vpack.c.bf16 %v1644_v29, %v1640_v62  ;;  %v1645_v1 = vmax.f32 %v1022_v59, 0.0  ;;  %v1379_v48 = vpop.f32.mrf.mxu1  ;;  %v1788_v20 = vpack.c.bf16 %v1620_v24, %v1616_v9  ;;  %v3738_v62 = vmax.f32 %v3725_v8, 0.0 }
 0x251   : > { %v1026_v56 = vpop.f32.mrf.mxu0  ;;  %1905 = vmatpush1.bf16.msra.mxu1 %v1792_v2  ;;  %v3372_v14 = vpack.c.bf16 %v1647_v35, %v1643_v50  ;;  %1962 = vmatpush2.bf16.msra.mxu0 %v1762_v30  ;;  %v1650_v17 = vmax.f32 %v1379_v48, 0.0  ;;  %v3735_v30 = vmax.f32 %v3713_v31, 0.0  ;;  %v3736_v50 = vmax.f32 %v3714_v5, 0.0 }
 0x252   : > { %v3377_v57 = vpack.c.bf16 %v1645_v1, %v1641_v63  ;;  %1906 = vmatprep.subr.bf16.mxu1 %v1789_v27  ;;  %v1381_v28 = vpop.f32.mrf.mxu1  ;;  %1963 = vmatprep.subr.bf16.mxu0 %v1759_v33  ;;  %v1755_v29 = vpack.c.bf16 %v3738_v62, %v3737_v58  ;;  %v1608_v3 = vmax.f32 %v3266_v19, 0.0  ;;  %v1754_v13 = vpack.c.bf16 %v1550_v18, %v1546_v55 }
 0x253   : > { %v1028_v53 = vpop.f32.mrf.mxu0  ;;  %v1751_v43 = vpack.c.bf16 %v3736_v50, %v3735_v30  ;;  %v1651_v42 = vmax.f32 %v1381_v28, 0.0  ;;  %v1597_v23 = vmax.f32 %v3241_v21, 0.0  ;;  %v1601_v31 = vmax.f32 %v3250_v0, 0.0  ;;  %v3743_v50 = vld [vmem:[#allocation20_spill] sm:$0xff] }
 0x254   : > { %v1383_v33 = vpop.f32.mrf.mxu1  ;;  %v1648_v5 = vmax.f32 %v1026_v56, 0.0  ;;  %v1604_v8 = vmax.f32 %v3254_v22, 0.0  ;;  %v1784_v2 = vpack.c.bf16 %v1612_v4, %v1608_v3  ;;  %v1649_v63 = vmax.f32 %v1028_v53, 0.0 }
 0x255   : > { %v1030_v47 = vpop.f32.mrf.mxu0  ;;  %1907 = vmatpush1.bf16.msra.mxu1 %v1788_v20  ;;  %v1654_v24 = vmax.f32 %v1383_v33, 0.0  ;;  %1964 = vmatpush2.bf16.msra.mxu0 %v1758_v60  ;;  %v1781_v27 = vpack.c.bf16 %v1605_v51, %v1601_v31  ;;  %v1600_v0 = vmax.f32 %v3245_v15, 0.0  ;;  %v1593_v22 = vmax.f32 %v3236_v41, 0.0 }
 0x256   : > { %v1652_v34 = vmax.f32 %v1030_v47, 0.0  ;;  %1908 = vmatprep.subr.bf16.mxu1 %v1785_v36  ;;  %v1385_v37 = vpop.f32.mrf.mxu1  ;;  %1965 = vmatprep.subr.bf16.mxu0 %v1755_v29  ;;  %v1596_v9 = vmax.f32 %v3239_v11, 0.0  ;;  %v1750_v54 = vpack.c.bf16 %v1542_v52, %v1538_v39  ;;  %v3739_v28 = vmax.f32 %v3711_v44, 0.0  ;;  %v3741_v44 = vld [vmem:[#allocation24_spill] sm:$0xff] }
 0x257   : > { %v1032_v59 = vpop.f32.mrf.mxu0  ;;  %v3393_v19 = vpack.c.bf16 %v1654_v24, %v1650_v17  ;;  %v1655_v35 = vmax.f32 %v1385_v37, 0.0  ;;  %v1780_v56 = vpack.c.bf16 %v1604_v8, %v1600_v0  ;;  %v1777_v26 = vpack.c.bf16 %v1597_v23, %v1593_v22 }
 0x258   : > { %v3395_v1 = vpack.c.bf16 %v1652_v34, %v1648_v5  ;;  %v1653_v48 = vmax.f32 %v1032_v59, 0.0  ;;  %v1389_v21 = vpop.f32.mrf.mxu1  ;;  %v3740_v4 = vmax.f32 %v3712_v7, 0.0  ;;  %v1592_v60 = vmax.f32 %v3228_v12, 0.0  ;;  %v3742_v12 = vld [vmem:[#allocation21_spill] sm:$0xff] }
 0x259   : > { %v3398_v32 = vpop.f32.mrf.mxu0  ;;  %1909 = vmatpush1.bf16.msra.mxu1 %v1784_v2  ;;  %v3400_v55 = vpack.c.bf16 %v1655_v35, %v1651_v42  ;;  %1966 = vmatpush2.bf16.msra.mxu0 %v1754_v13  ;;  %v1658_v15 = vmax.f32 %v1389_v21, 0.0 }
 0x25a   : > { %v3403_v16 = vpack.c.bf16 %v1653_v48, %v1649_v63  ;;  %1910 = vmatprep.subr.bf16.mxu1 %v1781_v27  ;;  %v3405_v18 = vpop.f32.mrf.mxu1  ;;  %1967 = vmatprep.subr.bf16.mxu0 %v1751_v43  ;;  %v1747_v20 = vpack.c.bf16 %v3740_v4, %v3739_v28  ;;  %v1776_v11 = vpack.c.bf16 %v1596_v9, %v1592_v60  ;;  %v3744_v43 = vld [vmem:[#allocation19_spill] sm:$0xff] }
 0x25b   : > { %v3408_v45 = vpop.f32.mrf.mxu0 }
 0x25c   : > { %v1393_v41 = vpop.f32.mrf.mxu1 }
 0x25d   : > { %v3415_v53 = vpop.f32.mrf.mxu0  ;;  %1911 = vmatpush1.bf16.msra.mxu1 %v1780_v56  ;;  %v1662_v17 = vmax.f32 %v1393_v41, 0.0  ;;  %1968 = vmatpush2.bf16.msra.mxu0 %v1750_v54 }
 0x25e   : > { %1912 = vmatprep.subr.bf16.mxu1 %v1777_v26  ;;  %1969 = vmatprep.subr.bf16.mxu0 %v1747_v20  ;;  %v3441_v3 = vpop.f32.mrf.mxu1 }
 0x25f   : > { %v3417_v39 = vpop.f32.mrf.mxu0  ;;  %v3419_v52 = vpack.c.bf16 %v1662_v17, %v1658_v15 }
 0x260   : > { %v3443_v47 = vpop.f32.mrf.mxu1 }
 0x261   : > { %v3421_v51 = vpop.f32.mrf.mxu0  ;;  %1913 = vmatpush1.bf16.msra.mxu1 %v1776_v11  ;;  %1970 = vmatpush2.bf16.msra.mxu0 %v3741_v44 }
 0x262   : > { %1914 = vmatprep.subr.bf16.mxu1 %v3233_v40  ;;  %1971 = vmatprep.subr.bf16.mxu0 %v3742_v12  ;;  %v3745_v40 = vld [vmem:[#allocation18_spill] sm:$0xff]  ;;  %v3445_v23 = vpop.f32.mrf.mxu1 }
 0x263   : > { %v3426_v7 = vpop.f32.mrf.mxu0 }
 0x264   : > { %v3447_v5 = vpop.f32.mrf.mxu1 }
 0x265   : > { %v3428_v30 = vpop.f32.mrf.mxu0  ;;  %1915 = vmatpush1.bf16.msra.mxu1 %v3225_v10  ;;  %1972 = vmatpush2.bf16.msra.mxu0 %v3743_v50 }
 0x266   : > { %1916 = vmatprep.subr.bf16.mxu1 %v3215_v49  ;;  %1973 = vmatprep.subr.bf16.mxu0 %v3744_v43  ;;  %v3449_v8 = vpop.f32.mrf.mxu1 }
 0x267   : > { %v3434_v36 = vpop.f32.mrf.mxu0 }
 0x268   : > { %v3451_v35 = vpop.f32.mrf.mxu1 }
 0x269   : > { %v3436_v58 = vpop.f32.mrf.mxu0  ;;  %1917 = vmatpush1.bf16.msra.mxu1 %v3209_v38  ;;  %1974 = vmatpush2.bf16.msra.mxu0 %v3745_v40 }
 0x26a   : > { %v3453_v9 = vpop.f32.mrf.mxu1 }
 0x26b   : > { %v1058_v62 = vpop.f32.mrf.mxu0 }
 0x26c   : > { %1976 = vmatmul.mubr.bf16.vlgmr.msra.gmra.mxu0 %v3039_v25  ;;  %v3455_v41 = vpop.f32.mrf.mxu1  ;;  %v1673_v40 = vmax.f32 %v1058_v62, 0.0 }
 0x26d   : > { %v1060_v29 = vpop.f32.mrf.mxu0 }
 0x26e   : > { %v3457_v43 = vpop.f32.mrf.mxu1 }
 0x26f   : > { %v1062_v33 = vpop.f32.mrf.mxu0 }
 0x270   : > { %v1677_v44 = vmax.f32 %v1062_v33, 0.0  ;;  %v1668_v33 = vmax.f32 %v3428_v30, 0.0 }
 0x271   : > { %v1066_v10 = vpop.f32.mrf.mxu0 }
 0x272   : > { %v1680_v50 = vmax.f32 %v1066_v10, 0.0 }
 0x273   : > { %v1068_v13 = vpop.f32.mrf.mxu0 }
 0x274   : > { %v1681_v60 = vmax.f32 %v1068_v13, 0.0  ;;  %v3461_v13 = vpop.f32.mrf.mxu1 }
 0x275   : > { %v1070_v49 = vpop.f32.mrf.mxu0 }
 0x276   : > { %v1684_v17 = vmax.f32 %v1070_v49, 0.0  ;;  %v1665_v49 = vmax.f32 %v3426_v7, 0.0  ;;  %v1656_v7 = vmax.f32 %v3398_v32, 0.0  ;;  %v3747_v32 = vld [vmem:[#allocation14_spill] sm:$0xff] }
 0x277   : > { %v1072_v42 = vpop.f32.mrf.mxu0 }
 0x278   : > { %v1685_v28 = vmax.f32 %v1072_v42, 0.0  ;;  %v1820_v42 = vpack.c.bf16 %v1684_v17, %v1680_v50  ;;  %v3753_v17 = vld [vmem:[#allocation57_spill] sm:$0xff] }
 0x279   : > { %v1076_v24 = vpop.f32.mrf.mxu0 }
 0x27a   : > { %v1688_v20 = vmax.f32 %v1076_v24, 0.0  ;;  %v1821_v12 = vpack.c.bf16 %v1685_v28, %v1681_v60  ;;  %v1817_v24 = vpack.c.bf16 %v1677_v44, %v1673_v40  ;;  %v3751_v28 = vld [vmem:[#allocation60_spill] sm:$0xff]  ;;  %v3754_v44 = vld [vmem:[#allocation59_spill] sm:$0xff]  ;;  %v3755_v40 = vld [vmem:[#allocation53_spill] sm:$0xff] }
 0x27b   : > { %v1078_v31 = vpop.f32.mrf.mxu0 }
 0x27c   : > { %v1689_v56 = vmax.f32 %v1078_v31, 0.0  ;;  %v1676_v31 = vmax.f32 %v1060_v29, 0.0  ;;  %v1664_v29 = vmax.f32 %v3421_v51, 0.0  ;;  %v1635_v51 = vmax.f32 %v3332_v61, 0.0 }
 0x27d   : > { %v1080_v38 = vpop.f32.mrf.mxu0 }
 0x27e   : > { %v1692_v15 = vmax.f32 %v1080_v38, 0.0  ;;  %v1669_v38 = vmax.f32 %v3434_v36, 0.0  ;;  %v1657_v36 = vmax.f32 %v3408_v45, 0.0  ;;  %v3746_v45 = vld [vmem:[#allocation12_spill] sm:$0xff] }
 0x27f   : > { %v1082_v34 = vpop.f32.mrf.mxu0 }
 0x280   : > { %v1693_v48 = vmax.f32 %v1082_v34, 0.0  ;;  %v1824_v11 = vpack.c.bf16 %v1692_v15, %v1688_v20  ;;  %v1672_v34 = vmax.f32 %v3436_v58, 0.0  ;;  %v1813_v62 = vpack.c.bf16 %v1669_v38, %v1665_v49  ;;  %v3750_v15 = vld [vmem:[#allocation15_spill] sm:$0xff] }
 0x281   : > { %v1086_v37 = vpop.f32.mrf.mxu0  ;;  %v1660_v58 = vmax.f32 %v3415_v53, 0.0  ;;  %v1631_v61 = vmax.f32 %v3750_v15, 0.0 }
 0x282   : > { %v1696_v22 = vmax.f32 %v1086_v37, 0.0  ;;  %v1825_v4 = vpack.c.bf16 %v1693_v48, %v1689_v56  ;;  %v1816_v10 = vpack.c.bf16 %v1676_v31, %v1672_v34  ;;  %v1661_v37 = vmax.f32 %v3417_v39, 0.0 }
 0x283   : > { %v1088_v2 = vpop.f32.mrf.mxu0  ;;  %v1808_v39 = vpack.c.bf16 %v1660_v58, %v1656_v7  ;;  %v1639_v48 = vmax.f32 %v3746_v45, 0.0  ;;  %v3487_v56 = vcombine.high %v3039_v25, %v3039_v25  ;;  %v3761_v58 = vld [vmem:[#allocation51_spill] sm:$0xff]  ;;  %v3763_v7 = vld [vmem:[#allocation49_spill] sm:$0xff] }
 0x284   : > { %v1697_v21 = vmax.f32 %v1088_v2, 0.0  ;;  %v3467_v2 = vpop.f32.mrf.mxu1 }
 0x285   : > { %v1090_v59 = vpop.f32.mrf.mxu0 }
 0x286   : > { %v1700_v27 = vmax.f32 %v1090_v59, 0.0  ;;  %v1812_v59 = vpack.c.bf16 %v1668_v33, %v1664_v29  ;;  %v3472_v30 = vpop.f32.mrf.mxu1 }
 0x287   : > { %v1092_v63 = vpop.f32.mrf.mxu0 }
 0x288   : > { %v1701_v0 = vmax.f32 %v1092_v63, 0.0  ;;  %v1828_v26 = vpack.c.bf16 %v1700_v27, %v1696_v22  ;;  %v1809_v27 = vpack.c.bf16 %v1661_v37, %v1657_v36  ;;  %v3474_v63 = vpop.f32.mrf.mxu1  ;;  %v3758_v37 = vld [vmem:[#allocation56_spill] sm:$0xff] }
 0x289   : > { %v3760_v36 = vld [vmem:[#allocation52_spill] sm:$0xff] }
 0x28a   : > { %v1829_v54 = vpack.c.bf16 %v1701_v0, %v1697_v21  ;;  %v3480_v53 = vpop.f32.mrf.mxu1  ;;  %v1634_v21 = vmax.f32 %v3747_v32, 0.0  ;;  %v3748_v0 = vld [vmem:[#allocation13_spill] sm:$0xff]  ;;  %v3765_v32 = vld [vmem:[#allocation47_spill] sm:$0xff] }
 0x28b   : > { %v1638_v22 = vmax.f32 %v3748_v0, 0.0 }
 0x28c   : > { %1918 = vmatprep.subr.bf16.mxu1 %v1829_v54  ;;  %v3749_v54 = vld [vmem:[#allocation17_spill] sm:$0xff] }
 0x28d   : > { %1919 = vmatpush2.bf16.msra.mxu1 %v1828_v26  ;;  %v1799_v26 = vpack.c.bf16 %v1639_v48, %v1635_v51  ;;  %v1798_v60 = vpack.c.bf16 %v1638_v22, %v1634_v21  ;;  %v3764_v51 = vld [vmem:[#allocation48_spill] sm:$0xff]  ;;  %v3766_v21 = vld [vmem:[#allocation46_spill] sm:$0xff] }
 0x28e   : > { %1920 = vmatprep.subr.bf16.mxu1 %v1825_v4  ;;  %v1626_v4 = vmax.f32 %v3751_v28, 0.0 }
 0x291   : > { %1921 = vmatpush2.bf16.msra.mxu1 %v1824_v11  ;;  %v1619_v11 = vmax.f32 %v3753_v17, 0.0  ;;  %v1682_v17 = vmax.f32 %v3461_v13, 0.0 }
 0x292   : > { %1922 = vmatprep.subr.bf16.mxu1 %v1821_v12  ;;  %v1623_v12 = vmax.f32 %v3754_v44, 0.0  ;;  %v1675_v44 = vmax.f32 %v3453_v9, 0.0  ;;  %v1670_v9 = vmax.f32 %v3447_v5, 0.0 }
 0x294   : > { %v1791_v34 = vpack.c.bf16 %v1623_v12, %v1619_v11  ;;  %v1679_v12 = vmax.f32 %v3457_v43, 0.0 }
 0x295   : > { %1923 = vmatpush2.bf16.msra.mxu1 %v1820_v42  ;;  %v3757_v42 = vld [vmem:[#allocation58_spill] sm:$0xff] }
 0x296   : > { %1924 = vmatprep.subr.bf16.mxu1 %v1817_v24  ;;  %v1622_v38 = vmax.f32 %v3757_v42, 0.0  ;;  %v1819_v13 = vpack.c.bf16 %v1679_v12, %v1675_v44 }
 0x299   : > { %1925 = vmatpush2.bf16.msra.mxu1 %v1816_v10 }
 0x29a   : > { %1926 = vmatprep.subr.bf16.mxu1 %v1813_v62  ;;  %v3759_v62 = vld [vmem:[#allocation54_spill] sm:$0xff] }
 0x29d   : > { %1927 = vmatpush2.bf16.msra.mxu1 %v1812_v59 }
 0x29e   : > { %1928 = vmatprep.subr.bf16.mxu1 %v1809_v27  ;;  %v3762_v27 = vld [vmem:[#allocation50_spill] sm:$0xff] }
 0x2a1   : > { %1929 = vmatpush2.bf16.msra.mxu1 %v1808_v39 }
 0x2a2   : > { %1930 = vmatprep.subr.bf16.mxu1 %v3403_v16  ;;  %v1627_v16 = vmax.f32 %v3749_v54, 0.0 }
 0x2a4   : > { %v1795_v25 = vpack.c.bf16 %v1631_v61, %v1627_v16  ;;  %v3767_v61 = vld [vmem:[#allocation45_spill] sm:$0xff] }
 0x2a5   : > { %1931 = vmatpush2.bf16.msra.mxu1 %v3395_v1  ;;  %v1431_v1 = vpop.f32.mrf.mxu1 }
 0x2a6   : > { %1932 = vmatprep.subr.bf16.mxu1 %v3377_v57  ;;  %v3752_v57 = vld [vmem:[#allocation61_spill] sm:$0xff]  ;;  %v1691_v54 = vmax.f32 %v1431_v1, 0.0  ;;  %v1686_v1 = vmax.f32 %v3472_v30, 0.0  ;;  %v1666_v30 = vmax.f32 %v3443_v47, 0.0 }
 0x2a7   : > { %v1630_v20 = vmax.f32 %v3752_v57, 0.0  ;;  %v1433_v50 = vpop.f32.mrf.mxu1  ;;  %v1683_v57 = vmax.f32 %v3467_v2, 0.0  ;;  %v1678_v2 = vmax.f32 %v3455_v41, 0.0 }
 0x2a8   : > { %v1694_v28 = vmax.f32 %v1433_v50, 0.0  ;;  %v1667_v50 = vmax.f32 %v3445_v23, 0.0  ;;  %v1814_v41 = vpack.c.bf16 %v1670_v9, %v1666_v30 }
 0x2a9   : > { %1933 = vmatpush2.bf16.msra.mxu1 %v3367_v46  ;;  %v3756_v46 = vld [vmem:[#allocation55_spill] sm:$0xff]  ;;  %v1794_v24 = vpack.c.bf16 %v1630_v20, %v1626_v4  ;;  %v1435_v49 = vpop.f32.mrf.mxu1  ;;  %v1687_v20 = vmax.f32 %v3474_v63, 0.0  ;;  %v1822_v63 = vpack.c.bf16 %v1686_v1, %v1682_v17 }
 0x2aa   : > { %1984 = vmatprep.subr.bf16.mxu1 %v1799_v26  ;;  %v1618_v31 = vmax.f32 %v3756_v46, 0.0  ;;  %v1695_v16 = vmax.f32 %v1435_v49, 0.0  ;;  %v1690_v26 = vmax.f32 %v3480_v53, 0.0  ;;  %v1674_v53 = vmax.f32 %v3451_v35, 0.0 }
 0x2ab   : > { %v1439_v10 = vpop.f32.mrf.mxu1  ;;  %v1659_v46 = vmax.f32 %v3405_v18, 0.0 }
 0x2ac   : > { %1935 = vmatmul.mubr.bf16.vlgmr.msra.gmra.mxu1 %v3487_v56  ;;  %v1790_v33 = vpack.c.bf16 %v1622_v38, %v1618_v31  ;;  %v1698_v0 = vmax.f32 %v1439_v10, 0.0  ;;  %v1826_v11 = vpack.c.bf16 %v1694_v28, %v1690_v26  ;;  %v1818_v43 = vpack.c.bf16 %v1678_v2, %v1674_v53 }
 0x2ad   : > { %1985 = vmatpush1.bf16.msra.mxu1 %v1798_v60  ;;  %2016 = vmatprep.mubr.bf16.mxu1 %v3755_v40  ;;  %v1441_v29 = vpop.f32.mrf.mxu1  ;;  %v1827_v60 = vpack.c.bf16 %v1695_v16, %v1691_v54  ;;  %v1671_v40 = vmax.f32 %v3449_v8, 0.0  ;;  %v1663_v31 = vmax.f32 %v3441_v3, 0.0 }
 0x2ae   : > { %1986 = vmatprep.subr.bf16.mxu1 %v1795_v25  ;;  %v1699_v45 = vmax.f32 %v1441_v29, 0.0  ;;  %v1823_v25 = vpack.c.bf16 %v1687_v20, %v1683_v57 }
 0x2af   : > { %v1443_v59 = vpop.f32.mrf.mxu1  ;;  %v1815_v35 = vpack.c.bf16 %v1671_v40, %v1667_v50  ;;  %v1811_v42 = vpack.c.bf16 %v1663_v31, %v1659_v46 }
 0x2b0   : > { %v1702_v22 = vmax.f32 %v1443_v59, 0.0 }
 0x2b1   : > { %1987 = vmatpush1.bf16.msra.mxu1 %v1794_v24  ;;  %v1445_v39 = vpop.f32.mrf.mxu1 }
 0x2b2   : > { %1988 = vmatprep.subr.bf16.mxu1 %v1791_v34  ;;  %v1703_v48 = vmax.f32 %v1445_v39, 0.0  ;;  %v1830_v4 = vpack.c.bf16 %v1702_v22, %v1698_v0 }
 0x2b4   : > { %v1831_v15 = vpack.c.bf16 %v1703_v48, %v1699_v45 }
 0x2b5   : > { %1989 = vmatpush1.bf16.msra.mxu1 %v1790_v33 }
 0x2b6   : > { %1990 = vmatprep.subr.bf16.mxu1 %v3758_v37 }
 0x2b9   : > { %1991 = vmatpush1.bf16.msra.mxu1 %v3759_v62 }
 0x2ba   : > { %1992 = vmatprep.subr.bf16.mxu1 %v3760_v36 }
 0x2bd   : > { %1993 = vmatpush1.bf16.msra.mxu1 %v3761_v58 }
 0x2be   : > { %1994 = vmatprep.subr.bf16.mxu1 %v3762_v27 }
 0x2c1   : > { %1995 = vmatpush1.bf16.msra.mxu1 %v3763_v7 }
 0x2c2   : > { %1996 = vmatprep.subr.bf16.mxu1 %v3764_v51 }
 0x2c5   : > { %1997 = vmatpush1.bf16.msra.mxu1 %v3765_v32 }
 0x2c6   : > { %1998 = vmatprep.subr.bf16.mxu1 %v3766_v21 }
 0x2c9   : > { %1999 = vmatpush1.bf16.msra.mxu1 %v3767_v61 }
 0x2ca   : > { %2000 = vmatprep.subr.bf16.mxu1 %v1831_v15 }
 0x2cd   : > { %2001 = vmatpush2.bf16.msra.mxu1 %v1830_v4 }
 0x2ce   : > { %2002 = vmatprep.subr.bf16.mxu1 %v1827_v60 }
 0x2d1   : > { %2003 = vmatpush2.bf16.msra.mxu1 %v1826_v11 }
 0x2d2   : > { %2004 = vmatprep.subr.bf16.mxu1 %v1823_v25 }
 0x2d5   : > { %2005 = vmatpush2.bf16.msra.mxu1 %v1822_v63 }
 0x2d6   : > { %2006 = vmatprep.subr.bf16.mxu1 %v1819_v13 }
 0x2d9   : > { %2007 = vmatpush2.bf16.msra.mxu1 %v1818_v43 }
 0x2da   : > { %2008 = vmatprep.subr.bf16.mxu1 %v1815_v35 }
 0x2dd   : > { %2009 = vmatpush2.bf16.msra.mxu1 %v1814_v41 }
 0x2de   : > { %2010 = vmatprep.subr.bf16.mxu1 %v1811_v42 }
 0x2e1   : > { %2011 = vmatpush2.bf16.msra.mxu1 %v3419_v52 }
 0x2e2   : > { %2012 = vmatprep.subr.bf16.mxu1 %v3400_v55 }
 0x2e5   : > { %2013 = vmatpush2.bf16.msra.mxu1 %v3393_v19 }
 0x2e6   : > { %2014 = vmatprep.subr.bf16.mxu1 %v3372_v14 }
 0x2e9   : > { %2015 = vmatpush2.bf16.msra.mxu1 %v3365_v6 }
 0x2ec   : > { %2017 = vmatmul.mubr.bf16.vlgmr.msra.gmra.mxu1 %v3487_v56  ;;  %v1895_v18 = vpop.f32.mrf.mxu0 }
 0x2ee   : > { %v1897_v3 = vpop.f32.mrf.mxu0 }
 0x2f0   : > { %v1899_v47 = vpop.f32.mrf.mxu0 }
 0x2f2   : > { %v1900_v23 = vpop.f32.mrf.mxu0 }
 0x32c   : > { %v1977_v5 = vpop.f32.mrf.mxu0 }
 0x32e   : > { %v1979_v8 = vpop.f32.mrf.mxu0 }
 0x330   : > { %v1981_v38 = vpop.f32.mrf.mxu0 }
 0x332   : > { %v1982_v24 = vpop.f32.mrf.mxu0 }
 0x36c   : > { %v1936_v34 = vpop.f32.mrf.mxu1 }
 0x36d   : > { %v1937_v52 = vadd.f32 %v1936_v34, %v1895_v18 }
 0x36e   : > { %v1938_v49 = vpop.f32.mrf.mxu1 }
 0x36f   : > { %v2027_v55 = vand.u32 2147483647, %v1937_v52  ;;  %v1939_v33 = vadd.f32 %v1938_v49, %v1897_v3  ;;  %v2025_v7 = vmax.f32 %v1937_v52, 0.0 }
 0x370   : > { %v1940_v19 = vpop.f32.mrf.mxu1 }
 0x371   : > { %v2029_v10 = vsub.f32 0.0, %v2027_v55  ;;  %v2028_v14 = vand.u32 2147483647, %v1939_v33  ;;  %v2026_v45 = vmax.f32 %v1939_v33, 0.0 }
 0x372   : > { %v1941_v37 = vpop.f32.mrf.mxu1 }
 0x373   : > { %v2031_v6 = vmul.f32 1.442695, %v2029_v10  ;;  %v2030_v62 = vsub.f32 0.0, %v2028_v14 }
 0x375   : > { %2518 = vpow2.f32 %v2031_v6  ;;  %v2033_v56 = vmul.f32 1.442695, %v2030_v62 }
 0x377   : > { %2520 = vpow2.f32 %v2033_v56 }
 0x382   : > { %v2519_v29 = vpop.eup %2518 }
 0x383   : > { %v2035_v36 = vadd.f32 1.0, %v2519_v29 }
 0x384   : > { %v2521_v58 = vpop.eup %2520 }
 0x385   : > { %2522 = vlog2.f32 %v2035_v36  ;;  %v2036_v59 = vadd.f32 1.0, %v2521_v58 }
 0x387   : > { %2524 = vlog2.f32 %v2036_v59 }
 0x392   : > { %v2523_v27 = vpop.eup %2522 }
 0x393   : > { %v2038_v39 = vmul.f32 0.6931472, %v2523_v27 }
 0x394   : > { %v2525_v51 = vpop.eup %2524 }
 0x395   : > { %v2040_v48 = vmul.f32 0.6931472, %v2525_v51  ;;  %v2041_v32 = vadd.f32 %v2038_v39, %v2025_v7 }
 0x397   : > { %v2042_v21 = vadd.f32 %v2040_v48, %v2026_v45  ;;  %v2064_v0 = vsel %vm2063_vm2, %v2041_v32, 0.0 }
 0x399   : > { %v2065_v22 = vsel %vm2063_vm2, %v2042_v21, 0.0 }
 0x39a   : > { %v2066_v54 = vadd.f32 %v2065_v22, %v2064_v0 }
 0x39c   : > { %2067 = vadd.xlane.f32.xlu0 %v2066_v54 }
 0x3ac   : > { %v2018_v16 = vpop.f32.mrf.mxu1 }
 0x3ad   : > { %v2019_v15 = vadd.f32 %v2018_v16, %v1977_v5 }
 0x3ae   : > { %v2020_v61 = vpop.f32.mrf.mxu1 }
 0x3af   : > { %v2043_v26 = vsub.f32 0.0, %v2019_v15  ;;  %v2021_v28 = vadd.f32 %v2020_v61, %v1979_v8 }
 0x3b0   : > { %v2022_v4 = vpop.f32.mrf.mxu1 }
 0x3b1   : > { %v2047_v57 = vand.u32 2147483647, %v2043_v26  ;;  %v2044_v20 = vsub.f32 0.0, %v2021_v28  ;;  %v2045_v40 = vmax.f32 %v2043_v26, 0.0 }
 0x3b2   : > { %v2023_v60 = vpop.f32.mrf.mxu1 }
 0x3b3   : > { %v2049_v17 = vsub.f32 0.0, %v2047_v57  ;;  %v2048_v1 = vand.u32 2147483647, %v2044_v20  ;;  %v2046_v9 = vmax.f32 %v2044_v20, 0.0 }
 0x3b5   : > { %v2051_v11 = vmul.f32 1.442695, %v2049_v17  ;;  %v2050_v44 = vsub.f32 0.0, %v2048_v1 }
 0x3b7   : > { %2526 = vpow2.f32 %v2051_v11  ;;  %v2053_v12 = vmul.f32 1.442695, %v2050_v44 }
 0x3b9   : > { %2528 = vpow2.f32 %v2053_v12 }
 0x3c4   : > { %v2527_v25 = vpop.eup %2526 }
 0x3c5   : > { %v2055_v53 = vadd.f32 1.0, %v2527_v25 }
 0x3c6   : > { %v2529_v2 = vpop.eup %2528 }
 0x3c7   : > { %2530 = vlog2.f32 %v2055_v53  ;;  %v2056_v63 = vadd.f32 1.0, %v2529_v2 }
 0x3c9   : > { %2532 = vlog2.f32 %v2056_v63 }
 0x3d4   : > { %v2531_v50 = vpop.eup %2530 }
 0x3d5   : > { %v2058_v13 = vmul.f32 0.6931472, %v2531_v50 }
 0x3d6   : > { %v2533_v30 = vpop.eup %2532 }
 0x3d7   : > { %v2060_v43 = vmul.f32 0.6931472, %v2533_v30  ;;  %v2061_v46 = vadd.f32 %v2058_v13, %v2045_v40 }
 0x3d9   : > { %v2062_v31 = vadd.f32 %v2060_v43, %v2046_v9  ;;  %v2077_v35 = vsel %vm2063_vm2, %v2061_v46, 0.0 }
 0x3db   : > { %v2078_v41 = vsel %vm2063_vm2, %v2062_v31, 0.0 }
 0x3dc   : > { %v2079_v42 = vadd.f32 %v2078_v41, %v2077_v35 }
 0x3de   : > { %2080 = vadd.xlane.f32.xlu1 %v2079_v42 }
 0x425   : > { %v2068_v18 = vpop.xlane.xlu0 %2067 }
 0x426   : > { %v2069_v3 = vrot.slane %v2068_v18, 4 }
 0x428   : > { %v2070_v47 = vadd.f32 %v2069_v3, %v2068_v18 }
 0x42a   : > { %v2071_v23 = vrot.slane %v2070_v47, 2 }
 0x42c   : > { %v2072_v5 = vadd.f32 %v2071_v23, %v2070_v47 }
 0x42e   : > { %v2073_v8 = vrot.slane %v2072_v5, 1 }
 0x42f   : > { %2547 = shalt.err (!%p2544_p3)
}
 0x430   : > { %s2548_s29 = scalar_lea.hbm %s3540_s11, 256  ;;  %s2552_s26 = scalar_lea.hbm %s3633_s5, 512 }
 0x431   : > { %p2549_p4 = scmp.ne.s32.totalorder %s3540_s11, %s2548_s29  ;;  %p2553_p9 = scmp.lt.s32.totalorder %s3540_s11, %s3633_s5 }
 0x432   : > { %p2554_p10 = scmp.lt.s32.totalorder %s2552_s26, %s2548_s29 }
 0x433   : > { %p2550_p7 = pnand %p2549_p4, %p2732_p5 }
 0x434   : > { %p2555_p11 = por %p2554_p10, %p2553_p9 }
 0x435   : > { %p2551_p8 = pneg %p2550_p7 }
 0x437   : > { %p2556_p12 = pnand %p2555_p11, %p2551_p8 }
 0x439   : > { %2559 = shalt.err (!%p2556_p12)
}
 0x43a   : > { %2432 = dma.vmem_to_hbm [thread:$0]  (%p2732_p5), %s2151_s12, 256, %s3540_s11, %s3548_s16   ;;  %v2074_v38 = vadd.f32 %v2073_v8, %v2072_v5 }
 0x43b   : > { %s2136_s18 = sshll.u32 %s2770_s28, 4  ;;  %s2112_s9 = scalar_lea.sflag [#allocation3], %s2758_s17  ;;  %s2137_s18 = int_to_ptr.vmem [resolvable:$true] %s2136_s18 }
 0x43c   : > { %s2560_s10 = scalar_lea.vmem %s2137_s18, 256  ;;  %s2655_s29 = smov [#allocation2]  }
 0x43d   : > { %p2561_p13 = scmp.ne.s32.totalorder %s2137_s18, %s2560_s10  ;;  %s2564_s19 = sshll.u32 %s2655_s29, 4  ;;  %s2565_s19 = int_to_ptr.vmem [resolvable:$false] %s2564_s19 }
 0x43e   : > { %s2566_s20 = scalar_lea.vmem %s2565_s19, 512  ;;  %p2567_p2 = scmp.lt.s32.totalorder %s2137_s18, %s2565_s19 }
 0x43f   : > { %p2562_p0 = pnand %p2561_p13, %p2732_p5  ;;  %p2568_p3 = scmp.lt.s32.totalorder %s2566_s20, %s2560_s10 }
 0x441   : > { %p2563_p1 = pneg %p2562_p0  ;;  %p2569_p4 = por %p2568_p3, %p2567_p2 }
 0x443   : > { %p2570_p7 = pnand %p2569_p4, %p2563_p1 }
 0x445   : > { %2573 = shalt.err (!%p2570_p7)
}
 0x446   : > { %s2574_s28 = scalar_lea.hbm %s3546_s15, 256  ;;  %s2578_s26 = scalar_lea.hbm %s3632_s4, 512 }
 0x447   : > { %p2575_p8 = scmp.ne.s32.totalorder %s3546_s15, %s2574_s28  ;;  %p2579_p11 = scmp.lt.s32.totalorder %s3546_s15, %s3632_s4 }
 0x448   : > { %p2580_p12 = scmp.lt.s32.totalorder %s2578_s26, %s2574_s28 }
 0x449   : > { %p2576_p9 = pnand %p2575_p8, %p2732_p5 }
 0x44a   : > { %p2581_p13 = por %p2580_p12, %p2579_p11 }
 0x44b   : > { %p2577_p10 = pneg %p2576_p9 }
 0x44d   : > { %p2582_p0 = pnand %p2581_p13, %p2577_p10 }
 0x44f   : > { %2585 = shalt.err (!%p2582_p0)
}
 0x450   : > { %2431 = dma.vmem_to_hbm [thread:$0]  (%p2732_p5), %s2137_s18, 256, %s3546_s15, %s2112_s9   ;;  %2427 = vpush %v2074_v38  ;;  %v3768_v10 = vld [vmem:[#allocation16_spill] sm:$0xff] }
 0x451   : > { %s2420_s10 = spop %2419  ;;  %s2301_s20 = sshll.u32 %s2758_s17, 3  ;;  %vm2097_vm3 = vcmp.eq.s32.totalorder %v3768_v10, 5  ;;  %vm2096_vm4 = vcmp.eq.s32.totalorder %v3768_v10, 4  ;;  %vm2095_vm5 = vcmp.eq.s32.totalorder %v3768_v10, 3  ;;  %vm2094_vm6 = vcmp.eq.s32.totalorder %v3768_v10, 2 }
 0x452   : > { %s2422_s29 = spop %2421  ;;  %vm2093_vm7 = vcmp.eq.s32.totalorder %v3768_v10, 1  ;;  %s2412_s15 = sshll.u32 %s2713_s25, 7  ;;  %vm2092_vm8 = vcmp.eq.s32.totalorder %v3768_v10, 0  ;;  %v2108_v27 = vstv %s2420_s10 }
 0x453   : > { %s2424_s19 = spop %2423  ;;  %s277_s17 = scalar_lea.vmem [#allocation6], %s2301_s20  ;;  %v2106_v58 = vstv %s2422_s29 }
 0x454   : > { %s2426_s28 = spop %2425  ;;  %s2163_s18 = sshll.u32 %s277_s17, 4  ;;  %v2104_v29 = vstv %s2424_s19  ;;  %s2164_s18 = int_to_ptr.vmem [resolvable:$true] %s2163_s18 }
 0x455   : > { %v2102_v62 = vstv %s2426_s28  ;;  %s2161_s13 = scalar_lea.hbm %s3634_s6, %s2412_s15  ;;  %s2586_s14 = scalar_lea.vmem %s2164_s18, 128 }
 0x456   : > { %p2587_p1 = scmp.ne.s32.totalorder %s2164_s18, %s2586_s14  ;;  %s2656_s25 = smov [#allocation6]  }
 0x457   : > { %s2590_s19 = sshll.u32 %s2656_s25, 4  ;;  %s2591_s19 = int_to_ptr.vmem [resolvable:$false] %s2590_s19 }
 0x458   : > { %p2588_p2 = pnand %p2587_p1, %p2732_p5  ;;  %s2592_s20 = scalar_lea.vmem %s2591_s19, 256 }
 0x459   : > { %p2593_p4 = scmp.lt.s32.totalorder %s2164_s18, %s2591_s19  ;;  %p2594_p7 = scmp.lt.s32.totalorder %s2592_s20, %s2586_s14 }
 0x45a   : > { %p2589_p3 = pneg %p2588_p2 }
 0x45b   : > { %p2595_p8 = por %p2594_p7, %p2593_p4 }
 0x45d   : > { %p2596_p9 = pnand %p2595_p8, %p2589_p3 }
 0x467   : > { %v2081_v24 = vpop.xlane.xlu1 %2080 }
 0x468   : > { %v2082_v34 = vrot.slane %v2081_v24, 4 }
 0x46a   : > { %v2083_v52 = vadd.f32 %v2082_v34, %v2081_v24 }
 0x46c   : > { %v2084_v49 = vrot.slane %v2083_v52, 2 }
 0x46e   : > { %v2085_v55 = vadd.f32 %v2084_v49, %v2083_v52 }
 0x470   : > { %v2086_v33 = vrot.slane %v2085_v55, 1 }
 0x472   : > { %v2087_v19 = vadd.f32 %v2086_v33, %v2085_v55 }
 0x474   : > { %2429 = vpush %v2087_v19 }
 0x481   : > { %s2428_s11 = spop %2427 }
 0x482   : > { %v2100_v37 = vstv %s2428_s11 }
 0x4a5   : > { %s2430_s12 = spop %2429 }
 0x4a6   : > { %v2098_v14 = vstv %s2430_s12 }
 0x4a7   : > { %v2099_v6 = vsel %vm2097_vm3, %v2098_v14, 0.0 }
 0x4a8   : > { %v2101_v56 = vsel %vm2096_vm4, %v2100_v37, %v2099_v6 }
 0x4a9   : > { %v2103_v36 = vsel %vm2095_vm5, %v2102_v62, %v2101_v56 }
 0x4aa   : > { %v2105_v59 = vsel %vm2094_vm6, %v2104_v29, %v2103_v36 }
 0x4ab   : > { %v2107_v7 = vsel %vm2093_vm7, %v2106_v58, %v2105_v59 }
 0x4ac   : > { %v2109_v39 = vsel %vm2092_vm8, %v2108_v27, %v2107_v7 }
 0x4ad   : > { %2110 = vst [vmem:[%s277_s17] sm:$0xff] %v2109_v39 }
 0x4ae   : > { %2599 = shalt.err (!%p2596_p9)
}
 0x4af   : > { %s2600_s10 = scalar_lea.hbm %s2161_s13, 128  ;;  %s2604_s11 = scalar_lea.hbm %s3634_s6, 256 }
 0x4b0   : > { %p2601_p10 = scmp.ne.s32.totalorder %s2161_s13, %s2600_s10  ;;  %p2605_p13 = scmp.lt.s32.totalorder %s2161_s13, %s3634_s6 }
 0x4b1   : > { %p2606_p0 = scmp.lt.s32.totalorder %s2604_s11, %s2600_s10 }
 0x4b2   : > { %p2602_p11 = pnand %p2601_p10, %p2732_p5 }
 0x4b3   : > { %p2607_p1 = por %p2606_p0, %p2605_p13 }
 0x4b4   : > { %p2603_p12 = pneg %p2602_p11 }
 0x4b6   : > { %p2608_p2 = pnand %p2607_p1, %p2603_p12 }
 0x4b8   : > { %2611 = shalt.err (!%p2608_p2)
}
 0x4b9   : > { %2433 = dma.vmem_to_hbm [thread:$0]  (%p2732_p5), %s2164_s18, 128, %s2161_s13, %s3548_s16  }
 0x4ba PF: > { %p2447_p3 = scmp.ge.s32.totalorder %s2650_s24, 2  ;;  %s2175_s17 = sand.u32 1, %s2638_s21  }
 0x4bb   : > { %s2176_s9 = scalar_lea.sflag [#allocation3], %s2175_s17 }
 0x4bc   : > { %p2438_p4 = pnand %p2447_p3, %p2736_p6 }
 0x4be   : > { %p2439_p7 = pneg %p2438_p4 }
 0x4c0   : > { %2629 = dma.done.wait (%p2439_p7), %s2176_s9, 256  }
 0x4c1   : > { %2631 = vsyncadd (%p2439_p7), %s2176_s9, 4294967040  ;;  %s3769_s26 = sadd.s32 4294967294, %s2650_s24  }
 0x4c2   : > { %s2184_s14 = sand.u32 1, %s3769_s26  }
 0x4c3   : > { %s2185_s25 = scalar_lea.sflag [#allocation5], %s2184_s14 }
 0x4c4   : > { %2633 = dma.done.wait (%p2439_p7), %s2185_s25, 384  }
 0x4c5   : > { %2635 = vsyncadd (%p2439_p7), %s2185_s25, 4294966912  ;;  %p20_p5 = scmp.ge.s32.totalorder %s2717_s27, 4   ;;  %s3770_s21 = smov %s2642_s22 }
 0x4c6   : > { %s3771_s22 = smov %s2646_s23  ;;  %s3772_s23 = smov %s2730_s30 }
 0x4c7   : > { %s3773_s24 = smov %s2717_s27  ;;  %22 = sbr.rel (!%p20_p5) target bundleno = 5 (0x5), region = 106 }
 0x4cc   :  { %2199 = vsyncpa [#allocation3], 1 }
 0x4cd   :  { %2201 = vsyncpa [#allocation3 + $0x1], 1 }
 0x4ce   :  { %2202 = vsyncpa [#allocation5], 1 }
 0x4cf   :  { %2204 = vsyncpa [#allocation5 + $0x1], 1 }

</bundles_post_ra>
